<compile_context>
chip_gen: v5e
topology: v5e:2x2
jax: 0.10.0
libtpu: 0.0.40
codegen_flags: <defaults>
</compile_context>

<pallas_src>
import jax
import jax.numpy as jnp
from jax.experimental import pallas as pl
from jax.experimental.pallas import tpu as pltpu

LN_EPS = 1e-5  # torch.nn.LayerNorm default


def _layernorm(x, gamma, beta):
    # LayerNorm over the last (feature) axis, matching nn.LayerNorm defaults
    # (eps=1e-5, biased variance).  Folded affine: xc * (inv*gamma) + beta.
    mu = jnp.mean(x, axis=-1, keepdims=True)
    xc = x - mu
    var = jnp.mean(xc * xc, axis=-1, keepdims=True)
    inv = jax.lax.rsqrt(var + LN_EPS)
    return xc * (inv * gamma) + beta


def dgltn_kernel(x_ref,
                 w1_ref, b1_ref, g1_ref, be1_ref,
                 w2_ref, b2_ref, g2_ref, be2_ref,
                 w3_ref, b3_ref,
                 o_ref, acc_ref):
    k = pl.program_id(1)

    @pl.when(k == 0)
    def _():
        acc_ref[...] = jnp.zeros_like(acc_ref)

    # Partial first matmul: bf16 MXU inputs, f32 accumulation over the K axis.
    acc_ref[...] += jnp.dot(x_ref[...], w1_ref[...],
                            preferred_element_type=jnp.float32)

    @pl.when(k == pl.num_programs(1) - 1)
    def _():
        # MLPBlock 1 epilogue (Dropout is identity at inference).
        h = jnp.maximum(acc_ref[...] + b1_ref[...], 0.0)
        h = _layernorm(h, g1_ref[...], be1_ref[...])

        # Residual(MLPBlock 2)
        r = jnp.dot(h.astype(w2_ref.dtype), w2_ref[...],
                    preferred_element_type=jnp.float32) + b2_ref[...]
        r = jnp.maximum(r, 0.0)
        r = _layernorm(r, g2_ref[...], be2_ref[...])
        h = h + r

        # Final Linear + sigmoid (logits in f32, sigmoid on the EUP).
        logits = jnp.dot(h.astype(w3_ref.dtype), w3_ref[...],
                         preferred_element_type=jnp.float32) + b3_ref[...]
        o_ref[...] = jax.nn.sigmoid(logits).astype(o_ref.dtype)


def _round_up(v, m):
    return (v + m - 1) // m * m


def _build_call(Bp, Dp, H, Gp, tm, tk, vmem_limit_bytes, single_buffer_params):
    const_kwargs = {}
    if single_buffer_params:
        # Constant-index parameter blocks never need the second pipeline buffer.
        const_kwargs["pipeline_mode"] = pl.Buffered(1)

    def const(shape):
        return pl.BlockSpec(shape, lambda i, k: (0, 0), **const_kwargs)

    return pl.pallas_call(
        dgltn_kernel,
        out_shape=jax.ShapeDtypeStruct((Bp, Gp), jnp.float32),
        grid_spec=pltpu.PrefetchScalarGridSpec(
            num_scalar_prefetch=0,
            grid=(Bp // tm, Dp // tk),
            in_specs=[
                pl.BlockSpec((tm, tk), lambda i, k: (i, k)),   # x tile
                pl.BlockSpec((tk, H), lambda i, k: (k, 0)),    # W1 tile (K-streamed)
                const((1, H)), const((1, H)), const((1, H)),   # b1, gamma1, beta1
                const((H, H)), const((1, H)), const((1, H)), const((1, H)),  # W2, b2, g2, be2
                const((H, Gp)), const((1, Gp)),                # W3, b3
            ],
            out_specs=pl.BlockSpec((tm, Gp), lambda i, k: (i, 0)),
            scratch_shapes=[pltpu.VMEM((tm, H), jnp.float32)],
        ),
        compiler_params=pltpu.CompilerParams(
            dimension_semantics=("parallel", "arbitrary"),
            vmem_limit_bytes=vmem_limit_bytes),
    )


def dgltn_forward(x, params, *, block_m=256, block_k=512,
                  param_dtype=jnp.bfloat16,
                  vmem_limit_bytes=48 * 1024 * 1024):
    """x: (B, nb_iprs) float32.  params: dict of kernel-layout parameters."""
    B, Din = x.shape
    H = params["w1"].shape[1]
    G = params["w3"].shape[1]
    if H % 128 != 0:
        raise ValueError("hidden dim must be a multiple of 128: the LayerNorm "
                         "axis cannot be zero-padded without changing its stats")

    # Tile sizes: fill the MXU M dimension (up to block_m rows); stream the Din
    # reduction in block_k chunks.  Pad batch / Din / nb_gos to tile multiples.
    tm = min(block_m, _round_up(B, 8))
    tk = min(block_k, _round_up(Din, 128))
    Bp = _round_up(B, tm)
    Dp = _round_up(Din, tk)
    Gp = _round_up(G, 128)  # lane-dense, unmasked output stores

    xp = jnp.pad(x, ((0, Bp - B), (0, Dp - Din))) if (Bp, Dp) != (B, Din) else x
    w1 = params["w1"]
    if Dp != Din:
        w1 = jnp.pad(w1, ((0, Dp - Din), (0, 0)))
    w3, b3 = params["w3"], params["b3"]
    if Gp != G:
        w3 = jnp.pad(w3, ((0, 0), (0, Gp - G)))
        b3 = jnp.pad(b3, ((0, 0), (0, Gp - G)))

    # bf16 MXU inputs; biases / LayerNorm affine stay f32 (f32 accumulation).
    xp = xp.astype(param_dtype)
    w1 = w1.astype(param_dtype)
    w2 = params["w2"].astype(param_dtype)
    w3 = w3.astype(param_dtype)

    args = (xp, w1, params["b1"], params["g1"], params["be1"],
            w2, params["b2"], params["g2"], params["be2"],
            w3, b3)

    try:
        out = _build_call(Bp, Dp, H, Gp, tm, tk,
                          vmem_limit_bytes, True)(*args)
    except Exception:
        # pl.Buffered(1) not supported by this JAX build -> default buffering.
        out = _build_call(Bp, Dp, H, Gp, tm, tk,
                          vmem_limit_bytes, False)(*args)

    return out[:B, :G]


def init_params(key, nb_iprs, hidden, nb_gos):
    """Deterministic synthetic parameters.

    PyTorch nn.Linear stores weight as (out, in); we initialize in that shape
    and pre-transpose to (in, out) for the kernel layout.
    """
    ks = jax.random.split(key, 6)
    w1_t = jax.random.normal(ks[0], (hidden, nb_iprs), jnp.float32) * 0.05
    b1 = jax.random.normal(ks[1], (hidden,), jnp.float32) * 0.05
    w2_t = jax.random.normal(ks[2], (hidden, hidden), jnp.float32) * 0.05
    b2 = jax.random.normal(ks[3], (hidden,), jnp.float32) * 0.05
    w3_t = jax.random.normal(ks[4], (nb_gos, hidden), jnp.float32) * 0.05
    b3 = jax.random.normal(ks[5], (nb_gos,), jnp.float32) * 0.05
    # LayerNorm affine params (torch default init: weight=1, bias=0)
    g1 = jnp.ones((hidden,), jnp.float32)
    be1 = jnp.zeros((hidden,), jnp.float32)
    g2 = jnp.ones((hidden,), jnp.float32)
    be2 = jnp.zeros((hidden,), jnp.float32)
    return {
        "w1": w1_t.T, "b1": b1[None, :], "g1": g1[None, :], "be1": be1[None, :],
        "w2": w2_t.T, "b2": b2[None, :], "g2": g2[None, :], "be2": be2[None, :],
        "w3": w3_t.T, "b3": b3[None, :],
    }


def dgltn_reference(x, p, param_dtype=jnp.bfloat16):
    """Pure-JAX reference mirroring the kernel's bf16-input / f32-accum math."""
    w1 = p["w1"].astype(param_dtype)
    w2 = p["w2"].astype(param_dtype)
    w3 = p["w3"].astype(param_dtype)
    h = jnp.dot(x.astype(param_dtype), w1,
                preferred_element_type=jnp.float32) + p["b1"]
    h = jnp.maximum(h, 0.0)
    h = _layernorm(h, p["g1"], p["be1"])
    r = jnp.dot(h.astype(param_dtype), w2,
                preferred_element_type=jnp.float32) + p["b2"]
    r = jnp.maximum(r, 0.0)
    r = _layernorm(r, p["g2"], p["be2"])
    h = h + r
    logits = jnp.dot(h.astype(param_dtype), w3,
                     preferred_element_type=jnp.float32) + p["b3"]
    return jax.nn.sigmoid(logits)


if __name__ == "__main__":
    # Small DGLTN: nb_iprs=300, nodes=[128], nb_gos=200, batch=12.
    # Shapes are deliberately NOT tile-aligned so the padding paths and the
    # multi-step K reduction (block_k=128 -> 3 K steps) are exercised.
    B, NB_IPRS, HIDDEN, NB_GOS = 12, 300, 128, 200

    key = jax.random.PRNGKey(0)
    kx, kp = jax.random.split(key)
    x = jax.random.normal(kx, (B, NB_IPRS), jnp.float32)
    params = init_params(kp, NB_IPRS, HIDDEN, NB_GOS)

    out = dgltn_forward(x, params, block_k=128)
    out = jax.block_until_ready(out)

    ref = dgltn_reference(x, params)
    assert out.shape == (B, NB_GOS)
    assert jnp.allclose(out, ref, atol=2e-3, rtol=2e-3), \
        float(jnp.max(jnp.abs(out - ref)))

    print("KERNEL_OK")
</pallas_src>

<mosaic_0001>
module attributes {stable_mosaic.version = 11 : i64} {
  func.func @dgltn_kernel(%arg0: i32, %arg1: i32, %arg2: memref<16x128xbf16, #tpu.memory_space<vmem>>, %arg3: memref<128x128xbf16, #tpu.memory_space<vmem>>, %arg4: memref<1x128xf32, #tpu.memory_space<vmem>>, %arg5: memref<1x128xf32, #tpu.memory_space<vmem>>, %arg6: memref<1x128xf32, #tpu.memory_space<vmem>>, %arg7: memref<128x128xbf16, #tpu.memory_space<vmem>>, %arg8: memref<1x128xf32, #tpu.memory_space<vmem>>, %arg9: memref<1x128xf32, #tpu.memory_space<vmem>>, %arg10: memref<1x128xf32, #tpu.memory_space<vmem>>, %arg11: memref<128x256xbf16, #tpu.memory_space<vmem>>, %arg12: memref<1x256xf32, #tpu.memory_space<vmem>>, %arg13: memref<16x256xf32, #tpu.memory_space<vmem>>, %arg14: memref<16x128xf32, #tpu.memory_space<vmem>>) attributes {dimension_semantics = [#tpu.dimension_semantics<parallel>, #tpu.dimension_semantics<arbitrary>], iteration_bounds = array<i64: 1, 3>, scalar_prefetch = 0 : i64, scratch_operands = 1 : i64, tpu.core_type = #tpu.core_type<tc>, window_params = [{transform_indices = @transform_0, window_bounds = array<i64: 16, 128>}, {transform_indices = @transform_1, window_bounds = array<i64: 128, 128>}, {pipeline_mode = #tpu.pipeline_mode<synchronous>, transform_indices = @transform_2, window_bounds = array<i64: 1, 128>}, {pipeline_mode = #tpu.pipeline_mode<synchronous>, transform_indices = @transform_3, window_bounds = array<i64: 1, 128>}, {pipeline_mode = #tpu.pipeline_mode<synchronous>, transform_indices = @transform_4, window_bounds = array<i64: 1, 128>}, {pipeline_mode = #tpu.pipeline_mode<synchronous>, transform_indices = @transform_5, window_bounds = array<i64: 128, 128>}, {pipeline_mode = #tpu.pipeline_mode<synchronous>, transform_indices = @transform_6, window_bounds = array<i64: 1, 128>}, {pipeline_mode = #tpu.pipeline_mode<synchronous>, transform_indices = @transform_7, window_bounds = array<i64: 1, 128>}, {pipeline_mode = #tpu.pipeline_mode<synchronous>, transform_indices = @transform_8, window_bounds = array<i64: 1, 128>}, {pipeline_mode = #tpu.pipeline_mode<synchronous>, transform_indices = @transform_9, window_bounds = array<i64: 128, 256>}, {pipeline_mode = #tpu.pipeline_mode<synchronous>, transform_indices = @transform_10, window_bounds = array<i64: 1, 256>}, {transform_indices = @transform_11, window_bounds = array<i64: 16, 256>}]} {
    %c0_i32 = arith.constant 0 : i32
    %0 = arith.cmpi eq, %arg1, %c0_i32 : i32
    %1 = arith.extui %0 : i1 to i32
    %c0_i32_0 = arith.constant 0 : i32
    %2 = arith.cmpi ne, %1, %c0_i32_0 : i32
    scf.if %2 {
      %cst_9 = arith.constant 0.000000e+00 : f32
      %12 = vector.broadcast %cst_9 : f32 to vector<16x128xf32>
      %c0_10 = arith.constant 0 : index
      %c0_11 = arith.constant 0 : index
      %13 = vector.load %arg14[%c0_10, %c0_11] : memref<16x128xf32, #tpu.memory_space<vmem>>, vector<16x128xf32>
      tpu.vector_store %arg14[%c0_10, %c0_11], %12 {strides = array<i32>} : memref<16x128xf32, #tpu.memory_space<vmem>>, vector<16x128xf32>,
    } else {
    }
    %c0 = arith.constant 0 : index
    %c0_1 = arith.constant 0 : index
    %3 = vector.load %arg14[%c0, %c0_1] : memref<16x128xf32, #tpu.memory_space<vmem>>, vector<16x128xf32>
    %c0_2 = arith.constant 0 : index
    %c0_3 = arith.constant 0 : index
    %4 = vector.load %arg2[%c0_2, %c0_3] : memref<16x128xbf16, #tpu.memory_space<vmem>>, vector<16x128xbf16>
    %c0_4 = arith.constant 0 : index
    %c0_5 = arith.constant 0 : index
    %5 = vector.load %arg3[%c0_4, %c0_5] : memref<128x128xbf16, #tpu.memory_space<vmem>>, vector<128x128xbf16>
    %cst = arith.constant dense<0.000000e+00> : vector<16x128xf32>
    %6 = tpu.matmul %4, %5, %cst {dimension_numbers = #tpu.dot_dimension_numbers<[1], [0], [0], [1], [0, 0, 1, 1], [], []>} : vector<16x128xbf16>, vector<128x128xbf16>, vector<16x128xf32> -> vector<16x128xf32>
    %7 = arith.addf %3, %6 : vector<16x128xf32>
    %c0_6 = arith.constant 0 : index
    %c0_7 = arith.constant 0 : index
    %8 = vector.load %arg14[%c0_6, %c0_7] : memref<16x128xf32, #tpu.memory_space<vmem>>, vector<16x128xf32>
    tpu.vector_store %arg14[%c0_6, %c0_7], %7 {strides = array<i32>} : memref<16x128xf32, #tpu.memory_space<vmem>>, vector<16x128xf32>,
    %c2_i32 = arith.constant 2 : i32
    %9 = arith.cmpi eq, %arg1, %c2_i32 : i32
    %10 = arith.extui %9 : i1 to i32
    %c0_i32_8 = arith.constant 0 : i32
    %11 = arith.cmpi ne, %10, %c0_i32_8 : i32
    scf.if %11 {
      %c0_9 = arith.constant 0 : index
      %c0_10 = arith.constant 0 : index
      %12 = vector.load %arg14[%c0_9, %c0_10] : memref<16x128xf32, #tpu.memory_space<vmem>>, vector<16x128xf32>
      %c0_11 = arith.constant 0 : index
      %c0_12 = arith.constant 0 : index
      %13 = vector.load %arg4[%c0_11, %c0_12] : memref<1x128xf32, #tpu.memory_space<vmem>>, vector<1x128xf32>
      %14 = vector.broadcast %13 : vector<1x128xf32> to vector<16x128xf32>
      %15 = arith.addf %12, %14 : vector<16x128xf32>
      %cst_13 = arith.constant 0.000000e+00 : f32
      %16 = vector.broadcast %cst_13 : f32 to vector<16x128xf32>
      %17 = arith.maximumf %15, %16 : vector<16x128xf32>
      %c0_14 = arith.constant 0 : index
      %c0_15 = arith.constant 0 : index
      %18 = vector.load %arg5[%c0_14, %c0_15] : memref<1x128xf32, #tpu.memory_space<vmem>>, vector<1x128xf32>
      %c0_16 = arith.constant 0 : index
      %c0_17 = arith.constant 0 : index
      %19 = vector.load %arg6[%c0_16, %c0_17] : memref<1x128xf32, #tpu.memory_space<vmem>>, vector<1x128xf32>
      %cst_18 = arith.constant dense<0.000000e+00> : vector<16xf32>
      %20 = vector.multi_reduction <add>, %17, %cst_18 [1] : vector<16x128xf32> to vector<16xf32>
      %21 = vector.shape_cast %20 : vector<16xf32> to vector<16x1xf32>
      %cst_19 = arith.constant 1.280000e+02 : f32
      %22 = vector.broadcast %cst_19 : f32 to vector<16x1xf32>
      %23 = arith.divf %21, %22 : vector<16x1xf32>
      %24 = vector.broadcast %23 : vector<16x1xf32> to vector<16x128xf32>
      %25 = arith.subf %17, %24 : vector<16x128xf32>
      %26 = arith.mulf %25, %25 : vector<16x128xf32>
      %cst_20 = arith.constant dense<0.000000e+00> : vector<16xf32>
      %27 = vector.multi_reduction <add>, %26, %cst_20 [1] : vector<16x128xf32> to vector<16xf32>
      %28 = vector.shape_cast %27 : vector<16xf32> to vector<16x1xf32>
      %cst_21 = arith.constant 1.280000e+02 : f32
      %29 = vector.broadcast %cst_21 : f32 to vector<16x1xf32>
      %30 = arith.divf %28, %29 : vector<16x1xf32>
      %cst_22 = arith.constant 9.99999974E-6 : f32
      %31 = vector.broadcast %cst_22 : f32 to vector<16x1xf32>
      %32 = arith.addf %30, %31 : vector<16x1xf32>
      %33 = math.rsqrt %32 : vector<16x1xf32>
      %34 = vector.broadcast %33 : vector<16x1xf32> to vector<16x128xf32>
      %35 = vector.broadcast %18 : vector<1x128xf32> to vector<16x128xf32>
      %36 = arith.mulf %34, %35 : vector<16x128xf32>
      %37 = arith.mulf %25, %36 : vector<16x128xf32>
      %38 = vector.broadcast %19 : vector<1x128xf32> to vector<16x128xf32>
      %39 = arith.addf %37, %38 : vector<16x128xf32>
      %40 = arith.truncf %39 : vector<16x128xf32> to vector<16x128xbf16>
      %c0_23 = arith.constant 0 : index
      %c0_24 = arith.constant 0 : index
      %41 = vector.load %arg7[%c0_23, %c0_24] : memref<128x128xbf16, #tpu.memory_space<vmem>>, vector<128x128xbf16>
      %cst_25 = arith.constant dense<0.000000e+00> : vector<16x128xf32>
      %42 = tpu.matmul %40, %41, %cst_25 {dimension_numbers = #tpu.dot_dimension_numbers<[1], [0], [0], [1], [0, 0, 1, 1], [], []>} : vector<16x128xbf16>, vector<128x128xbf16>, vector<16x128xf32> -> vector<16x128xf32>
      %c0_26 = arith.constant 0 : index
      %c0_27 = arith.constant 0 : index
      %43 = vector.load %arg8[%c0_26, %c0_27] : memref<1x128xf32, #tpu.memory_space<vmem>>, vector<1x128xf32>
      %44 = vector.broadcast %43 : vector<1x128xf32> to vector<16x128xf32>
      %45 = arith.addf %42, %44 : vector<16x128xf32>
      %cst_28 = arith.constant 0.000000e+00 : f32
      %46 = vector.broadcast %cst_28 : f32 to vector<16x128xf32>
      %47 = arith.maximumf %45, %46 : vector<16x128xf32>
      %c0_29 = arith.constant 0 : index
      %c0_30 = arith.constant 0 : index
      %48 = vector.load %arg9[%c0_29, %c0_30] : memref<1x128xf32, #tpu.memory_space<vmem>>, vector<1x128xf32>
      %c0_31 = arith.constant 0 : index
      %c0_32 = arith.constant 0 : index
      %49 = vector.load %arg10[%c0_31, %c0_32] : memref<1x128xf32, #tpu.memory_space<vmem>>, vector<1x128xf32>
      %cst_33 = arith.constant dense<0.000000e+00> : vector<16xf32>
      %50 = vector.multi_reduction <add>, %47, %cst_33 [1] : vector<16x128xf32> to vector<16xf32>
      %51 = vector.shape_cast %50 : vector<16xf32> to vector<16x1xf32>
      %cst_34 = arith.constant 1.280000e+02 : f32
      %52 = vector.broadcast %cst_34 : f32 to vector<16x1xf32>
      %53 = arith.divf %51, %52 : vector<16x1xf32>
      %54 = vector.broadcast %53 : vector<16x1xf32> to vector<16x128xf32>
      %55 = arith.subf %47, %54 : vector<16x128xf32>
      %56 = arith.mulf %55, %55 : vector<16x128xf32>
      %cst_35 = arith.constant dense<0.000000e+00> : vector<16xf32>
      %57 = vector.multi_reduction <add>, %56, %cst_35 [1] : vector<16x128xf32> to vector<16xf32>
      %58 = vector.shape_cast %57 : vector<16xf32> to vector<16x1xf32>
      %cst_36 = arith.constant 1.280000e+02 : f32
      %59 = vector.broadcast %cst_36 : f32 to vector<16x1xf32>
      %60 = arith.divf %58, %59 : vector<16x1xf32>
      %cst_37 = arith.constant 9.99999974E-6 : f32
      %61 = vector.broadcast %cst_37 : f32 to vector<16x1xf32>
      %62 = arith.addf %60, %61 : vector<16x1xf32>
      %63 = math.rsqrt %62 : vector<16x1xf32>
      %64 = vector.broadcast %63 : vector<16x1xf32> to vector<16x128xf32>
      %65 = vector.broadcast %48 : vector<1x128xf32> to vector<16x128xf32>
      %66 = arith.mulf %64, %65 : vector<16x128xf32>
      %67 = arith.mulf %55, %66 : vector<16x128xf32>
      %68 = vector.broadcast %49 : vector<1x128xf32> to vector<16x128xf32>
      %69 = arith.addf %67, %68 : vector<16x128xf32>
      %70 = arith.addf %39, %69 : vector<16x128xf32>
      %71 = arith.truncf %70 : vector<16x128xf32> to vector<16x128xbf16>
      %c0_38 = arith.constant 0 : index
      %c0_39 = arith.constant 0 : index
      %72 = vector.load %arg11[%c0_38, %c0_39] : memref<128x256xbf16, #tpu.memory_space<vmem>>, vector<128x256xbf16>
      %cst_40 = arith.constant dense<0.000000e+00> : vector<16x256xf32>
      %73 = tpu.matmul %71, %72, %cst_40 {dimension_numbers = #tpu.dot_dimension_numbers<[1], [0], [0], [1], [0, 0, 1, 1], [], []>} : vector<16x128xbf16>, vector<128x256xbf16>, vector<16x256xf32> -> vector<16x256xf32>
      %c0_41 = arith.constant 0 : index
      %c0_42 = arith.constant 0 : index
      %74 = vector.load %arg12[%c0_41, %c0_42] : memref<1x256xf32, #tpu.memory_space<vmem>>, vector<1x256xf32>
      %75 = vector.broadcast %74 : vector<1x256xf32> to vector<16x256xf32>
      %76 = arith.addf %73, %75 : vector<16x256xf32>
      %77 = arith.negf %76 : vector<16x256xf32>
      %78 = math.exp %77 : vector<16x256xf32>
      %cst_43 = arith.constant 1.000000e+00 : f32
      %79 = vector.broadcast %cst_43 : f32 to vector<16x256xf32>
      %80 = arith.addf %79, %78 : vector<16x256xf32>
      %81 = arith.divf %79, %80 : vector<16x256xf32>
      %c0_44 = arith.constant 0 : index
      %c0_45 = arith.constant 0 : index
      %82 = vector.load %arg13[%c0_44, %c0_45] : memref<16x256xf32, #tpu.memory_space<vmem>>, vector<16x256xf32>
      tpu.vector_store %arg13[%c0_44, %c0_45], %81 {strides = array<i32>} : memref<16x256xf32, #tpu.memory_space<vmem>>, vector<16x256xf32>,
    } else {
    }
    return
  }
  func.func @transform_0(%arg0: i32, %arg1: i32) -> (i32, i32) {
    %c0_i32 = arith.constant 0 : i32
    return %arg0, %arg1 : i32, i32
  }
  func.func @transform_1(%arg0: i32, %arg1: i32) -> (i32, i32) {
    %c0_i32 = arith.constant 0 : i32
    %c0_i32_0 = arith.constant 0 : i32
    return %arg1, %c0_i32 : i32, i32
  }
  func.func @transform_2(%arg0: i32, %arg1: i32) -> (i32, i32) {
    %c0_i32 = arith.constant 0 : i32
    %c0_i32_0 = arith.constant 0 : i32
    %c0_i32_1 = arith.constant 0 : i32
    return %c0_i32, %c0_i32_0 : i32, i32
  }
  func.func @transform_3(%arg0: i32, %arg1: i32) -> (i32, i32) {
    %c0_i32 = arith.constant 0 : i32
    %c0_i32_0 = arith.constant 0 : i32
    %c0_i32_1 = arith.constant 0 : i32
    return %c0_i32, %c0_i32_0 : i32, i32
  }
  func.func @transform_4(%arg0: i32, %arg1: i32) -> (i32, i32) {
    %c0_i32 = arith.constant 0 : i32
    %c0_i32_0 = arith.constant 0 : i32
    %c0_i32_1 = arith.constant 0 : i32
    return %c0_i32, %c0_i32_0 : i32, i32
  }
  func.func @transform_5(%arg0: i32, %arg1: i32) -> (i32, i32) {
    %c0_i32 = arith.constant 0 : i32
    %c0_i32_0 = arith.constant 0 : i32
    %c0_i32_1 = arith.constant 0 : i32
    return %c0_i32, %c0_i32_0 : i32, i32
  }
  func.func @transform_6(%arg0: i32, %arg1: i32) -> (i32, i32) {
    %c0_i32 = arith.constant 0 : i32
    %c0_i32_0 = arith.constant 0 : i32
    %c0_i32_1 = arith.constant 0 : i32
    return %c0_i32, %c0_i32_0 : i32, i32
  }
  func.func @transform_7(%arg0: i32, %arg1: i32) -> (i32, i32) {
    %c0_i32 = arith.constant 0 : i32
    %c0_i32_0 = arith.constant 0 : i32
    %c0_i32_1 = arith.constant 0 : i32
    return %c0_i32, %c0_i32_0 : i32, i32
  }
  func.func @transform_8(%arg0: i32, %arg1: i32) -> (i32, i32) {
    %c0_i32 = arith.constant 0 : i32
    %c0_i32_0 = arith.constant 0 : i32
    %c0_i32_1 = arith.constant 0 : i32
    return %c0_i32, %c0_i32_0 : i32, i32
  }
  func.func @transform_9(%arg0: i32, %arg1: i32) -> (i32, i32) {
    %c0_i32 = arith.constant 0 : i32
    %c0_i32_0 = arith.constant 0 : i32
    %c0_i32_1 = arith.constant 0 : i32
    return %c0_i32, %c0_i32_0 : i32, i32
  }
  func.func @transform_10(%arg0: i32, %arg1: i32) -> (i32, i32) {
    %c0_i32 = arith.constant 0 : i32
    %c0_i32_0 = arith.constant 0 : i32
    %c0_i32_1 = arith.constant 0 : i32
    return %c0_i32, %c0_i32_0 : i32, i32
  }
  func.func @transform_11(%arg0: i32, %arg1: i32) -> (i32, i32) {
    %c0_i32 = arith.constant 0 : i32
    %c0_i32_0 = arith.constant 0 : i32
    return %arg0, %c0_i32 : i32, i32
  }
}

module attributes {stable_mosaic.version = 11 : i64} {
  func.func @dgltn_kernel(%arg0: i32, %arg1: i32, %arg2: memref<16x128xbf16, #tpu.memory_space<vmem>>, %arg3: memref<128x128xbf16, #tpu.memory_space<vmem>>, %arg4: memref<1x128xf32, #tpu.memory_space<vmem>>, %arg5: memref<1x128xf32, #tpu.memory_space<vmem>>, %arg6: memref<1x128xf32, #tpu.memory_space<vmem>>, %arg7: memref<128x128xbf16, #tpu.memory_space<vmem>>, %arg8: memref<1x128xf32, #tpu.memory_space<vmem>>, %arg9: memref<1x128xf32, #tpu.memory_space<vmem>>, %arg10: memref<1x128xf32, #tpu.memory_space<vmem>>, %arg11: memref<128x256xbf16, #tpu.memory_space<vmem>>, %arg12: memref<1x256xf32, #tpu.memory_space<vmem>>, %arg13: memref<16x256xf32, #tpu.memory_space<vmem>>, %arg14: memref<16x128xf32, #tpu.memory_space<vmem>>) attributes {dimension_semantics = [#tpu.dimension_semantics<parallel>, #tpu.dimension_semantics<arbitrary>], iteration_bounds = array<i64: 1, 3>, scalar_prefetch = 0 : i64, scratch_operands = 1 : i64, tpu.core_type = #tpu.core_type<tc>, window_params = [{transform_indices = @transform_0, window_bounds = array<i64: 16, 128>}, {transform_indices = @transform_1, window_bounds = array<i64: 128, 128>}, {pipeline_mode = #tpu.pipeline_mode<synchronous>, transform_indices = @transform_2, window_bounds = array<i64: 1, 128>}, {pipeline_mode = #tpu.pipeline_mode<synchronous>, transform_indices = @transform_3, window_bounds = array<i64: 1, 128>}, {pipeline_mode = #tpu.pipeline_mode<synchronous>, transform_indices = @transform_4, window_bounds = array<i64: 1, 128>}, {pipeline_mode = #tpu.pipeline_mode<synchronous>, transform_indices = @transform_5, window_bounds = array<i64: 128, 128>}, {pipeline_mode = #tpu.pipeline_mode<synchronous>, transform_indices = @transform_6, window_bounds = array<i64: 1, 128>}, {pipeline_mode = #tpu.pipeline_mode<synchronous>, transform_indices = @transform_7, window_bounds = array<i64: 1, 128>}, {pipeline_mode = #tpu.pipeline_mode<synchronous>, transform_indices = @transform_8, window_bounds = array<i64: 1, 128>}, {pipeline_mode = #tpu.pipeline_mode<synchronous>, transform_indices = @transform_9, window_bounds = array<i64: 128, 256>}, {pipeline_mode = #tpu.pipeline_mode<synchronous>, transform_indices = @transform_10, window_bounds = array<i64: 1, 256>}, {transform_indices = @transform_11, window_bounds = array<i64: 16, 256>}]} {
    %c0_i32 = arith.constant 0 : i32
    %0 = arith.cmpi eq, %arg1, %c0_i32 : i32
    %1 = arith.extui %0 : i1 to i32
    %c0_i32_0 = arith.constant 0 : i32
    %2 = arith.cmpi ne, %1, %c0_i32_0 : i32
    scf.if %2 {
      %cst_9 = arith.constant 0.000000e+00 : f32
      %12 = vector.broadcast %cst_9 : f32 to vector<16x128xf32>
      %c0_10 = arith.constant 0 : index
      %c0_11 = arith.constant 0 : index
      %13 = vector.load %arg14[%c0_10, %c0_11] : memref<16x128xf32, #tpu.memory_space<vmem>>, vector<16x128xf32>
      tpu.vector_store %arg14[%c0_10, %c0_11], %12 {strides = array<i32>} : memref<16x128xf32, #tpu.memory_space<vmem>>, vector<16x128xf32>,
    } else {
    }
    %c0 = arith.constant 0 : index
    %c0_1 = arith.constant 0 : index
    %3 = vector.load %arg14[%c0, %c0_1] : memref<16x128xf32, #tpu.memory_space<vmem>>, vector<16x128xf32>
    %c0_2 = arith.constant 0 : index
    %c0_3 = arith.constant 0 : index
    %4 = vector.load %arg2[%c0_2, %c0_3] : memref<16x128xbf16, #tpu.memory_space<vmem>>, vector<16x128xbf16>
    %c0_4 = arith.constant 0 : index
    %c0_5 = arith.constant 0 : index
    %5 = vector.load %arg3[%c0_4, %c0_5] : memref<128x128xbf16, #tpu.memory_space<vmem>>, vector<128x128xbf16>
    %cst = arith.constant dense<0.000000e+00> : vector<16x128xf32>
    %6 = tpu.matmul %4, %5, %cst {dimension_numbers = #tpu.dot_dimension_numbers<[1], [0], [0], [1], [0, 0, 1, 1], [], []>} : vector<16x128xbf16>, vector<128x128xbf16>, vector<16x128xf32> -> vector<16x128xf32>
    %7 = arith.addf %3, %6 : vector<16x128xf32>
    %c0_6 = arith.constant 0 : index
    %c0_7 = arith.constant 0 : index
    %8 = vector.load %arg14[%c0_6, %c0_7] : memref<16x128xf32, #tpu.memory_space<vmem>>, vector<16x128xf32>
    tpu.vector_store %arg14[%c0_6, %c0_7], %7 {strides = array<i32>} : memref<16x128xf32, #tpu.memory_space<vmem>>, vector<16x128xf32>,
    %c2_i32 = arith.constant 2 : i32
    %9 = arith.cmpi eq, %arg1, %c2_i32 : i32
    %10 = arith.extui %9 : i1 to i32
    %c0_i32_8 = arith.constant 0 : i32
    %11 = arith.cmpi ne, %10, %c0_i32_8 : i32
    scf.if %11 {
      %c0_9 = arith.constant 0 : index
      %c0_10 = arith.constant 0 : index
      %12 = vector.load %arg14[%c0_9, %c0_10] : memref<16x128xf32, #tpu.memory_space<vmem>>, vector<16x128xf32>
      %c0_11 = arith.constant 0 : index
      %c0_12 = arith.constant 0 : index
      %13 = vector.load %arg4[%c0_11, %c0_12] : memref<1x128xf32, #tpu.memory_space<vmem>>, vector<1x128xf32>
      %14 = vector.broadcast %13 : vector<1x128xf32> to vector<16x128xf32>
      %15 = arith.addf %12, %14 : vector<16x128xf32>
      %cst_13 = arith.constant 0.000000e+00 : f32
      %16 = vector.broadcast %cst_13 : f32 to vector<16x128xf32>
      %17 = arith.maximumf %15, %16 : vector<16x128xf32>
      %c0_14 = arith.constant 0 : index
      %c0_15 = arith.constant 0 : index
      %18 = vector.load %arg5[%c0_14, %c0_15] : memref<1x128xf32, #tpu.memory_space<vmem>>, vector<1x128xf32>
      %c0_16 = arith.constant 0 : index
      %c0_17 = arith.constant 0 : index
      %19 = vector.load %arg6[%c0_16, %c0_17] : memref<1x128xf32, #tpu.memory_space<vmem>>, vector<1x128xf32>
      %cst_18 = arith.constant dense<0.000000e+00> : vector<16xf32>
      %20 = vector.multi_reduction <add>, %17, %cst_18 [1] : vector<16x128xf32> to vector<16xf32>
      %21 = vector.shape_cast %20 : vector<16xf32> to vector<16x1xf32>
      %cst_19 = arith.constant 1.280000e+02 : f32
      %22 = vector.broadcast %cst_19 : f32 to vector<16x1xf32>
      %23 = arith.divf %21, %22 : vector<16x1xf32>
      %24 = vector.broadcast %23 : vector<16x1xf32> to vector<16x128xf32>
      %25 = arith.subf %17, %24 : vector<16x128xf32>
      %26 = arith.mulf %25, %25 : vector<16x128xf32>
      %cst_20 = arith.constant dense<0.000000e+00> : vector<16xf32>
      %27 = vector.multi_reduction <add>, %26, %cst_20 [1] : vector<16x128xf32> to vector<16xf32>
      %28 = vector.shape_cast %27 : vector<16xf32> to vector<16x1xf32>
      %cst_21 = arith.constant 1.280000e+02 : f32
      %29 = vector.broadcast %cst_21 : f32 to vector<16x1xf32>
      %30 = arith.divf %28, %29 : vector<16x1xf32>
      %cst_22 = arith.constant 9.99999974E-6 : f32
      %31 = vector.broadcast %cst_22 : f32 to vector<16x1xf32>
      %32 = arith.addf %30, %31 : vector<16x1xf32>
      %33 = math.rsqrt %32 : vector<16x1xf32>
      %34 = vector.broadcast %33 : vector<16x1xf32> to vector<16x128xf32>
      %35 = vector.broadcast %18 : vector<1x128xf32> to vector<16x128xf32>
      %36 = arith.mulf %34, %35 : vector<16x128xf32>
      %37 = arith.mulf %25, %36 : vector<16x128xf32>
      %38 = vector.broadcast %19 : vector<1x128xf32> to vector<16x128xf32>
      %39 = arith.addf %37, %38 : vector<16x128xf32>
      %40 = arith.truncf %39 : vector<16x128xf32> to vector<16x128xbf16>
      %c0_23 = arith.constant 0 : index
      %c0_24 = arith.constant 0 : index
      %41 = vector.load %arg7[%c0_23, %c0_24] : memref<128x128xbf16, #tpu.memory_space<vmem>>, vector<128x128xbf16>
      %cst_25 = arith.constant dense<0.000000e+00> : vector<16x128xf32>
      %42 = tpu.matmul %40, %41, %cst_25 {dimension_numbers = #tpu.dot_dimension_numbers<[1], [0], [0], [1], [0, 0, 1, 1], [], []>} : vector<16x128xbf16>, vector<128x128xbf16>, vector<16x128xf32> -> vector<16x128xf32>
      %c0_26 = arith.constant 0 : index
      %c0_27 = arith.constant 0 : index
      %43 = vector.load %arg8[%c0_26, %c0_27] : memref<1x128xf32, #tpu.memory_space<vmem>>, vector<1x128xf32>
      %44 = vector.broadcast %43 : vector<1x128xf32> to vector<16x128xf32>
      %45 = arith.addf %42, %44 : vector<16x128xf32>
      %cst_28 = arith.constant 0.000000e+00 : f32
      %46 = vector.broadcast %cst_28 : f32 to vector<16x128xf32>
      %47 = arith.maximumf %45, %46 : vector<16x128xf32>
      %c0_29 = arith.constant 0 : index
      %c0_30 = arith.constant 0 : index
      %48 = vector.load %arg9[%c0_29, %c0_30] : memref<1x128xf32, #tpu.memory_space<vmem>>, vector<1x128xf32>
      %c0_31 = arith.constant 0 : index
      %c0_32 = arith.constant 0 : index
      %49 = vector.load %arg10[%c0_31, %c0_32] : memref<1x128xf32, #tpu.memory_space<vmem>>, vector<1x128xf32>
      %cst_33 = arith.constant dense<0.000000e+00> : vector<16xf32>
      %50 = vector.multi_reduction <add>, %47, %cst_33 [1] : vector<16x128xf32> to vector<16xf32>
      %51 = vector.shape_cast %50 : vector<16xf32> to vector<16x1xf32>
      %cst_34 = arith.constant 1.280000e+02 : f32
      %52 = vector.broadcast %cst_34 : f32 to vector<16x1xf32>
      %53 = arith.divf %51, %52 : vector<16x1xf32>
      %54 = vector.broadcast %53 : vector<16x1xf32> to vector<16x128xf32>
      %55 = arith.subf %47, %54 : vector<16x128xf32>
      %56 = arith.mulf %55, %55 : vector<16x128xf32>
      %cst_35 = arith.constant dense<0.000000e+00> : vector<16xf32>
      %57 = vector.multi_reduction <add>, %56, %cst_35 [1] : vector<16x128xf32> to vector<16xf32>
      %58 = vector.shape_cast %57 : vector<16xf32> to vector<16x1xf32>
      %cst_36 = arith.constant 1.280000e+02 : f32
      %59 = vector.broadcast %cst_36 : f32 to vector<16x1xf32>
      %60 = arith.divf %58, %59 : vector<16x1xf32>
      %cst_37 = arith.constant 9.99999974E-6 : f32
      %61 = vector.broadcast %cst_37 : f32 to vector<16x1xf32>
      %62 = arith.addf %60, %61 : vector<16x1xf32>
      %63 = math.rsqrt %62 : vector<16x1xf32>
      %64 = vector.broadcast %63 : vector<16x1xf32> to vector<16x128xf32>
      %65 = vector.broadcast %48 : vector<1x128xf32> to vector<16x128xf32>
      %66 = arith.mulf %64, %65 : vector<16x128xf32>
      %67 = arith.mulf %55, %66 : vector<16x128xf32>
      %68 = vector.broadcast %49 : vector<1x128xf32> to vector<16x128xf32>
      %69 = arith.addf %67, %68 : vector<16x128xf32>
      %70 = arith.addf %39, %69 : vector<16x128xf32>
      %71 = arith.truncf %70 : vector<16x128xf32> to vector<16x128xbf16>
      %c0_38 = arith.constant 0 : index
      %c0_39 = arith.constant 0 : index
      %72 = vector.load %arg11[%c0_38, %c0_39] : memref<128x256xbf16, #tpu.memory_space<vmem>>, vector<128x256xbf16>
      %cst_40 = arith.constant dense<0.000000e+00> : vector<16x256xf32>
      %73 = tpu.matmul %71, %72, %cst_40 {dimension_numbers = #tpu.dot_dimension_numbers<[1], [0], [0], [1], [0, 0, 1, 1], [], []>} : vector<16x128xbf16>, vector<128x256xbf16>, vector<16x256xf32> -> vector<16x256xf32>
      %c0_41 = arith.constant 0 : index
      %c0_42 = arith.constant 0 : index
      %74 = vector.load %arg12[%c0_41, %c0_42] : memref<1x256xf32, #tpu.memory_space<vmem>>, vector<1x256xf32>
      %75 = vector.broadcast %74 : vector<1x256xf32> to vector<16x256xf32>
      %76 = arith.addf %73, %75 : vector<16x256xf32>
      %77 = arith.negf %76 : vector<16x256xf32>
      %78 = math.exp %77 : vector<16x256xf32>
      %cst_43 = arith.constant 1.000000e+00 : f32
      %79 = vector.broadcast %cst_43 : f32 to vector<16x256xf32>
      %80 = arith.addf %79, %78 : vector<16x256xf32>
      %81 = arith.divf %79, %80 : vector<16x256xf32>
      %c0_44 = arith.constant 0 : index
      %c0_45 = arith.constant 0 : index
      %82 = vector.load %arg13[%c0_44, %c0_45] : memref<16x256xf32, #tpu.memory_space<vmem>>, vector<16x256xf32>
      tpu.vector_store %arg13[%c0_44, %c0_45], %81 {strides = array<i32>} : memref<16x256xf32, #tpu.memory_space<vmem>>, vector<16x256xf32>,
    } else {
    }
    return
  }
  func.func @transform_0(%arg0: i32, %arg1: i32) -> (i32, i32) {
    %c0_i32 = arith.constant 0 : i32
    return %arg0, %arg1 : i32, i32
  }
  func.func @transform_1(%arg0: i32, %arg1: i32) -> (i32, i32) {
    %c0_i32 = arith.constant 0 : i32
    %c0_i32_0 = arith.constant 0 : i32
    return %arg1, %c0_i32 : i32, i32
  }
  func.func @transform_2(%arg0: i32, %arg1: i32) -> (i32, i32) {
    %c0_i32 = arith.constant 0 : i32
    %c0_i32_0 = arith.constant 0 : i32
    %c0_i32_1 = arith.constant 0 : i32
    return %c0_i32, %c0_i32_0 : i32, i32
  }
  func.func @transform_3(%arg0: i32, %arg1: i32) -> (i32, i32) {
    %c0_i32 = arith.constant 0 : i32
    %c0_i32_0 = arith.constant 0 : i32
    %c0_i32_1 = arith.constant 0 : i32
    return %c0_i32, %c0_i32_0 : i32, i32
  }
  func.func @transform_4(%arg0: i32, %arg1: i32) -> (i32, i32) {
    %c0_i32 = arith.constant 0 : i32
    %c0_i32_0 = arith.constant 0 : i32
    %c0_i32_1 = arith.constant 0 : i32
    return %c0_i32, %c0_i32_0 : i32, i32
  }
  func.func @transform_5(%arg0: i32, %arg1: i32) -> (i32, i32) {
    %c0_i32 = arith.constant 0 : i32
    %c0_i32_0 = arith.constant 0 : i32
    %c0_i32_1 = arith.constant 0 : i32
    return %c0_i32, %c0_i32_0 : i32, i32
  }
  func.func @transform_6(%arg0: i32, %arg1: i32) -> (i32, i32) {
    %c0_i32 = arith.constant 0 : i32
    %c0_i32_0 = arith.constant 0 : i32
    %c0_i32_1 = arith.constant 0 : i32
    return %c0_i32, %c0_i32_0 : i32, i32
  }
  func.func @transform_7(%arg0: i32, %arg1: i32) -> (i32, i32) {
    %c0_i32 = arith.constant 0 : i32
    %c0_i32_0 = arith.constant 0 : i32
    %c0_i32_1 = arith.constant 0 : i32
    return %c0_i32, %c0_i32_0 : i32, i32
  }
  func.func @transform_8(%arg0: i32, %arg1: i32) -> (i32, i32) {
    %c0_i32 = arith.constant 0 : i32
    %c0_i32_0 = arith.constant 0 : i32
    %c0_i32_1 = arith.constant 0 : i32
    return %c0_i32, %c0_i32_0 : i32, i32
  }
  func.func @transform_9(%arg0: i32, %arg1: i32) -> (i32, i32) {
    %c0_i32 = arith.constant 0 : i32
    %c0_i32_0 = arith.constant 0 : i32
    %c0_i32_1 = arith.constant 0 : i32
    return %c0_i32, %c0_i32_0 : i32, i32
  }
  func.func @transform_10(%arg0: i32, %arg1: i32) -> (i32, i32) {
    %c0_i32 = arith.constant 0 : i32
    %c0_i32_0 = arith.constant 0 : i32
    %c0_i32_1 = arith.constant 0 : i32
    return %c0_i32, %c0_i32_0 : i32, i32
  }
  func.func @transform_11(%arg0: i32, %arg1: i32) -> (i32, i32) {
    %c0_i32 = arith.constant 0 : i32
    %c0_i32_0 = arith.constant 0 : i32
    return %arg0, %c0_i32 : i32, i32
  }
}

</mosaic_0001>

<bundles_post_ra>
// kernel: tpu_custom_call.1
= control target key start
LH: loop header
LB: loop body
LE: loop exit
PB: predicated region body
PF: predicated region fallthrough
CT: control target
= control target key end

     0   :  { %s2095_s0 = inlined_call_operand.hbm [shape: bf16[16,384], index: 0, kind: input, shape index: {}]   ;;  %s2096_s1 = inlined_call_operand.hbm [shape: bf16[384,128], index: 1, kind: input, shape index: {}]   ;;  %s2097_s2 = inlined_call_operand.vmem [shape: f32[1,128], index: 2, kind: input, shape index: {}]   ;;  %s2098_s3 = inlined_call_operand.hbm [shape: f32[1,128], index: 3, kind: input, shape index: {}]   ;;  %s2099_s4 = inlined_call_operand.hbm [shape: f32[1,128], index: 4, kind: input, shape index: {}]   ;;  %s2100_s5 = inlined_call_operand.hbm [shape: bf16[128,128], index: 5, kind: input, shape index: {}]   ;;  %s2101_s6 = inlined_call_operand.vmem [shape: f32[1,128], index: 6, kind: input, shape index: {}]   ;;  %s2102_s7 = inlined_call_operand.vmem [shape: f32[1,128], index: 7, kind: input, shape index: {}]   ;;  %s2103_s8 = inlined_call_operand.vmem [shape: f32[1,128], index: 8, kind: input, shape index: {}]   ;;  %s2104_s9 = inlined_call_operand.hbm [shape: bf16[128,256], index: 9, kind: input, shape index: {}]   ;;  %s2105_s10 = inlined_call_operand.vmem [shape: f32[1,256], index: 10, kind: input, shape index: {}]   ;;  %s2106_s11 = inlined_call_operand.hbm [shape: f32[16,256], index: 11, kind: output, shape index: {}]  }
   0x1   :  { %2113 = sst [smem:[#allocation24_spill]] %s2095_s0 }
   0x2   :  { %2114 = sst [smem:[#allocation25_spill]] %s2098_s3 }
   0x3   :  { %2115 = sst [smem:[#allocation26_spill]] %s2099_s4 }
   0x4   :  { %2116 = sst [smem:[#allocation27_spill]] %s2100_s5 }
   0x5   :  { %2117 = sst [smem:[#allocation28_spill]] %s2104_s9 }
   0x6   :  { %2118 = sst [smem:[#allocation29_spill]] %s2106_s11 }
   0x7   :  { %16 = vsyncpa [#allocation4], 0 }
   0x8   :  { %18 = vsyncpa [#allocation4 + $0x1], 0 }
   0x9   :  { %19 = vsyncpa [#allocation7], 0 }
   0xa   :  { %21 = vsyncpa [#allocation7 + $0x1], 0 }
   0xb   :  { %22 = vsyncpa [#allocation10], 0 }
   0xc   :  { %23 = vsyncpa [#allocation13], 0 }
   0xd   :  { %24 = vsyncpa [#allocation5], 0  ;;  %s1881_s17 = smov 0   ;;  %s1883_s18 = smov 0  }
   0xe   :  { %s1885_s19 = smov 0   ;;  %s1887_s20 = smov 0  }
   0xf   :  { %s1889_s21 = smov 0   ;;  %s1891_s22 = smov 0  }
  0x10 LB: > { %2119 = sst [smem:[#allocation21_spill]] %s1793_s19  ;;  %s1910_s23 = sadd.s32 4294967295, %s1805_s22   ;;  %s1805_s22 = sphi %s1891_s22, %s30_s22   ;;  %s1801_s21 = sphi %s1889_s21, %s2141_s21   ;;  %s1797_s20 = sphi %s1887_s20, %s2140_s20   ;;  %s1793_s19 = sphi %s1885_s19, %s2136_s19   ;;  %s1789_s18 = sphi %s1883_s18, %s2139_s18   ;;  %s1785_s17 = sphi %s1881_s17, %s2138_s17  }
  0x11   : > { %p64_p0 = scmp.ne.s32.totalorder %s1789_s18, %s1785_s17  ;;  %p65_p1 = scmp.eq.s32.totalorder %s1910_s23, 0 }
  0x12   : > { %p1184_p2 = scmp.ge.s32.totalorder %s1805_s22, 1  ;;  %p316_p3 = scmp.lt.s32.totalorder %s1805_s22, 4 }
  0x13   : > { %p1918_p4 = por %p65_p1, %p64_p0  ;;  %s2121_s3 = sld [smem:[#allocation25_spill]] }
  0x14   : > { %p1925_p5 = pnand %p1184_p2, %p316_p3  ;;  %s1807_s29 = smov [#allocation8]  }
  0x15   : > { %s333_s30 = sshll.u32 %s1807_s29, 4  ;;  %s2123_s4 = sld [smem:[#allocation26_spill]]  ;;  %s334_s30 = int_to_ptr.vmem [resolvable:$true] %s333_s30 }
  0x16   : > { %p1402_p6 = pneg %p1925_p5  ;;  %s2125_s5 = sld [smem:[#allocation27_spill]] }
  0x17   : > { %s1808_s26 = smov [#allocation9]   ;;  %s1809_s12 = smov [#allocation11]  }
  0x18   : > { %p1936_p7 = pnand %p1402_p6, %p65_p1  ;;  %s345_s29 = sshll.u32 %s1808_s26, 4  ;;  %s346_s29 = int_to_ptr.vmem [resolvable:$true] %s345_s29 }
  0x19   : > { %s331_s27 = sshll.u32 %s2121_s3, 4  ;;  %s356_s13 = sshll.u32 %s1809_s12, 4  ;;  %s332_s27 = int_to_ptr.hbm [resolvable:$true] %s331_s27  ;;  %s357_s13 = int_to_ptr.vmem [resolvable:$true] %s356_s13 }
  0x1a   : > { %1405 = dma.hbm_to_vmem [thread:$0]  (!%p1936_p7), %s332_s27, 16, %s334_s30, [#allocation7]  }
  0x1b   : > { %s343_s14 = sshll.u32 %s2123_s4, 4  ;;  %s2126_s9 = sld [smem:[#allocation28_spill]]  ;;  %s344_s14 = int_to_ptr.hbm [resolvable:$true] %s343_s14 }
  0x1c   : > { %s354_s25 = sshll.u32 %s2125_s5, 4  ;;  %s2107_s17 = smov 64   ;;  %s355_s25 = int_to_ptr.hbm [resolvable:$true] %s354_s25 }
  0x1d   : > { %1408 = dma.hbm_to_vmem [thread:$0]  (!%p1936_p7), %s344_s14, 16, %s346_s29, [#allocation10]  }
  0x1e   : > { %s2109_s27 = smov 4   ;;  %s1812_s30 = smov [#allocation12]  }
  0x1f   : > { %1411 = dma.hbm_to_vmem [thread:$0]  (!%p1936_p7), %s355_s25, 1024, %s357_s13, [#allocation10], %s2107_s17, %s2107_s17, %s2109_s27  }
  0x20   : > { %s379_s14 = sshll.u32 %s1812_s30, 4  ;;  %s1813_s26 = smov 128   ;;  %s380_s14 = int_to_ptr.vmem [resolvable:$true] %s379_s14 }
  0x21   : > { %s377_s16 = sshll.u32 %s2126_s9, 4  ;;  %s1814_s3 = smov 8   ;;  %s378_s16 = int_to_ptr.hbm [resolvable:$true] %s377_s16 }
  0x22   : > { %1414 = dma.hbm_to_vmem [thread:$0]  (!%p1936_p7), %s378_s16, 2048, %s380_s14, [#allocation13], %s1813_s26, %s1813_s26, %s1814_s3  }
  0x23   : > { %s39_s4 = sadd.s32 1, %s1801_s21  ;;  %s51_s29 = sadd.s32 1, %s1793_s19 }
  0x24   : > { %p40_p8 = scmp.ge.s32.totalorder %s39_s4, 3  ;;  %p58_p9 = scmp.ne.s32.totalorder %s1793_s19, %s1789_s18 }
  0x25   : > { %p59_p10 = scmp.eq.s32.totalorder %s1805_s22, 0  ;;  %p1426_p11 = scmp.lt.s32.totalorder %s1805_s22, 3 }
  0x26   : > { %s2143_s4 = smov (%p40_p8, %s39_s4), 0  ;;  %s396_s12 = sand.u32 1, %s1793_s19  }
  0x27   : > { %2127 = sst [smem:[#allocation22_spill]] %s2143_s4  ;;  %p1965_p12 = por %p59_p10, %p58_p9 }
  0x28   : > { %s47_s13 = ssub.s32 %s1801_s21, %s2143_s4  ;;  %s1190_s15 = sshll.u32 %s396_s12, 3 }
  0x29   : > { %p49_p13 = scmp.eq.s32.totalorder %s47_s13, 0  ;;  %s1191_s16 = sshll.u32 %s1801_s21, 2 }
  0x2a   : > { %s2130_s0 = sld [smem:[#allocation24_spill]]  ;;  %s400_s17 = scalar_lea.vmem [#allocation3], %s1190_s15 }
  0x2b   : > { %s1974_s30 = scalar_select %p49_p13, %s1793_s19, %s51_s29  }
  0x2c   : > { %s410_s27 = sshll.u32 %s400_s17, 4  ;;  %p1983_p0 = pnand %p1426_p11, %p1965_p12  ;;  %s411_s27 = int_to_ptr.vmem [resolvable:$true] %s410_s27 }
  0x2d   : > { %2129 = sst [smem:[#allocation23_spill]] %s1974_s30  ;;  %s420_s13 = sand.u32 1, %s1805_s22  }
  0x2e   : > { %s397_s29 = scalar_lea.sflag [#allocation4], %s396_s12  ;;  %s1815_s4 = smov 192  }
  0x2f   : > { %s2132_s30 = smov 4   ;;  %s2133_s14 = smov 64  }
  0x30   : > { %s407_s3 = scalar_lea.hbm %s2130_s0, %s1191_s16  ;;  %s1192_s15 = sshll.u32 %s396_s12, 6 }
  0x31   : > { %s408_s5 = sshll.u32 %s407_s3, 4  ;;  %s1344_s17 = sshll.u32 %s1801_s21, 6  ;;  %s409_s5 = int_to_ptr.hbm [resolvable:$true] %s408_s5 }
  0x32   : > { %1418 = dma.hbm_to_vmem [thread:$0]  (!%p1983_p0), %s409_s5, 128, %s411_s27, %s397_s29, %s1815_s4, %s2133_s14, %s2132_s30  }
  0x33   : > { %s429_s25 = scalar_lea.hbm %s2096_s1, %s1344_s17  ;;  %s424_s0 = scalar_lea.vmem [#allocation6], %s1192_s15 }
  0x34   : > { %s430_s3 = sshll.u32 %s429_s25, 4  ;;  %s432_s19 = sshll.u32 %s424_s0, 4  ;;  %s431_s3 = int_to_ptr.hbm [resolvable:$true] %s430_s3  ;;  %s433_s19 = int_to_ptr.vmem [resolvable:$true] %s432_s19 }
  0x35   : > { %s421_s11 = scalar_lea.sflag [#allocation7], %s420_s13  ;;  %444 = sbr.rel (%p1925_p5) target bundleno = 1118 (0x45e), region = 64 }
  0x36   : > { %1421 = dma.hbm_to_vmem [thread:$0]  (!%p1983_p0), %s431_s3, 1024, %s433_s19, %s421_s11, %s2133_s14, %s2133_s14, %s2132_s30  }
  0x37   : > { %s446_s5 = sand.u32 (!%p1925_p5), 1, %s1789_s18  }
  0x38   : > { %s1196_s27 = sshll.u32 (!%p1925_p5), %s446_s5, 3  ;;  %s447_s4 = scalar_lea.sflag (!%p1925_p5), [#allocation4], %s446_s5 }
  0x39   : > { %s2004_s12 = scalar_lea.vmem (!%p1925_p5), [#allocation3], %s1196_s27 }
  0x3a   : > { %1760 = dma.done.wait (%p1918_p4), %s447_s4, 128  }
  0x3b   : > { %1762 = vsyncadd (%p1918_p4), %s447_s4, 4294967168  ;;  %s456_s0 = sand.u32 1, %s1910_s23   ;;  %s1197_s9 = sshll.u32 %s446_s5, 6 }
  0x3c   : > { %s457_s11 = scalar_lea.sflag [#allocation7], %s456_s0  ;;  %s460_s19 = scalar_lea.vmem [#allocation6], %s1197_s9 }
  0x3d   : > { %1764 = dma.done.wait (%p1918_p4), %s457_s11, 1024  }
  0x3e   : > { %1766 = vsyncadd (%p1918_p4), %s457_s11, 4294966272 }
  0x3f   : > { %1768 = dma.done.wait (%p65_p1), [#allocation7], 16  }
  0x40   : > { %1770 = vsyncadd (%p65_p1), [#allocation7], 4294967280 }
  0x41   : > { %1772 = dma.done.wait (%p65_p1), [#allocation10], 1040  }
  0x42   : > { %1774 = vsyncadd (%p65_p1), [#allocation10], 4294966256 }
  0x43   : > { %1776 = dma.done.wait (%p65_p1), [#allocation13], 2048  }
  0x44   : > { %1778 = vsyncadd (%p65_p1), [#allocation13], 4294965248  ;;  %p1202_p2 = scmp.ne.s32.totalorder %s1797_s20, 0 }
  0x46   : > { %526 = sbr.rel (%p1202_p2) target bundleno = 78 (0x4e), region = 92 }
  0x4b   : > { %v1816_v0 = vmov 0.0  }
  0x4c   : > { %527 = vst [vmem:[#allocation2] sm:$0xff] %v1816_v0 }
  0x4d   : > { %528 = vst [vmem:[#allocation2 + $0x8] sm:$0xff] %v1816_v0 }
  0x4e PF: > { %v1353_v1 = vld [vmem:[%s460_s19 + $0x38] sm:$0xff]  ;;  %v1352_v2 = vld [vmem:[%s460_s19 + $0x30] sm:$0xff]  ;;  %v1351_v3 = vld [vmem:[%s460_s19 + $0x28] sm:$0xff]  ;;  %p1239_p1 = scmp.ne.s32.totalorder %s1797_s20, 2 }
  0x4f   : > { %603 = vmatpush.bf16.msra.mxu0 %v1353_v1  ;;  %v1350_v4 = vld [vmem:[%s460_s19 + $0x20] sm:$0xff]  ;;  %v1349_v5 = vld [vmem:[%s460_s19 + $0x18] sm:$0xff]  ;;  %v1348_v6 = vld [vmem:[%s460_s19 + $0x10] sm:$0xff] }
  0x50   : > { %v1347_v7 = vld [vmem:[%s460_s19 + $0x8] sm:$0xff]  ;;  %v1346_v8 = vld [vmem:[%s460_s19] sm:$0xff]  ;;  %v1345_v9 = vld [vmem:[%s2004_s12] sm:$0xff] }
  0x53   : > { %604 = vmatpush.bf16.msra.mxu0 %v1352_v2  ;;  %v529_v10 = vld [vmem:[#allocation2] sm:$0xff] }
  0x54   : > { %v530_v13 = vld [vmem:[#allocation2 + $0x8] sm:$0xff] }
  0x57   : > { %605 = vmatpush.bf16.msra.mxu0 %v1351_v3 }
  0x5b   : > { %606 = vmatpush.bf16.msra.mxu0 %v1350_v4 }
  0x5f   : > { %607 = vmatpush.bf16.msra.mxu0 %v1349_v5 }
  0x63   : > { %608 = vmatpush.bf16.msra.mxu0 %v1348_v6 }
  0x67   : > { %609 = vmatpush.bf16.msra.mxu0 %v1347_v7 }
  0x6b   : > { %610 = vmatpush.bf16.msra.mxu0 %v1346_v8 }
  0x6e   : > { %611 = vmatmul.bf16.vlgmr.msra.gmra.mxu0 %v1345_v9 }
  0xeb   : > { %v612_v11 = vpop.f32.mrf.mxu0 }
  0xec   : > { %v617_v12 = vadd.f32 %v612_v11, %v529_v10 }
  0xee   : > { %619 = vst [vmem:[#allocation2] sm:$0xff] %v617_v12 }
  0xf2   : > { %624 = sbr.rel (%p1239_p1) target bundleno = 1108 (0x454), region = 96 }
  0xf3   : > { %v614_v14 = vpop.f32.mrf.mxu0 }
  0xf4   : > { %v618_v15 = vadd.f32 %v614_v14, %v530_v13 }
  0xf6   : > { %620 = vst [vmem:[#allocation2 + $0x8] sm:$0xff] %v618_v15 }
  0xf7   : > { %v625_v16 = vld [vmem:[#allocation2] sm:$0xff]  ;;  %v1817_v23 = vmov 128.0   ;;  %v1360_v39 = vld [vmem:[#allocation11 + $0x30] sm:$0xff]  ;;  %v1359_v40 = vld [vmem:[#allocation11 + $0x28] sm:$0xff] }
  0xf8   : > { %v1495_v17 = vld [vmem:[%s2097_s2] ss:$0 sm:$0xff]  ;;  %1501 = vrcp.f32 %v1817_v23  ;;  %v1358_v41 = vld [vmem:[#allocation11 + $0x20] sm:$0xff]  ;;  %v1356_v43 = vld [vmem:[#allocation11 + $0x10] sm:$0xff] }
  0xf9   : > { %v631_v18 = vadd.f32 %v1495_v17, %v625_v16  ;;  %v1361_v38 = vld [vmem:[#allocation11 + $0x38] sm:$0xff]  ;;  %v1355_v44 = vld [vmem:[#allocation11 + $0x8] sm:$0xff]  ;;  %v1354_v46 = vld [vmem:[#allocation11] sm:$0xff] }
  0xfa   : > { %763 = vmatpush.bf16.msra.mxu0 %v1361_v38  ;;  %v1357_v42 = vld [vmem:[#allocation11 + $0x18] sm:$0xff] }
  0xfb   : > { %v633_v20 = vmax.f32 %v631_v18, 0.0  ;;  %v1496_v61 = vld [vmem:[#allocation8] ss:$0 sm:$0xff]  ;;  %v1497_v6 = vld [vmem:[#allocation9] ss:$0 sm:$0xff] }
  0xfc   : > { %v1498_v11 = vld [vmem:[%s2101_s6] ss:$0 sm:$0xff] }
  0xfd   : > { %v626_v19 = vld [vmem:[#allocation2 + $0x8] sm:$0xff]  ;;  %637 = vadd.xlane.f32.xlu0 %v633_v20 }
  0xfe   : > { %v632_v21 = vadd.f32 %v1495_v17, %v626_v19  ;;  %v1502_v24 = vpop.eup %1501  ;;  %764 = vmatpush.bf16.msra.mxu0 %v1360_v39  ;;  %v1314_v39 = vld [vmem:[#allocation12 + $0x50] sm:$0xf] }
  0xff   : > { %v642_v25 = vmul.f32 128.0, %v1502_v24  ;;  %vm646_vm0 = vweird.f32 %v1502_v24 }
 0x100   : > { %v634_v22 = vmax.f32 %v632_v21, 0.0 }
 0x101   : > { %v643_v26 = vsub.f32 1.0, %v642_v25 }
 0x102   : > { %765 = vmatpush.bf16.msra.mxu0 %v1359_v40  ;;  %v1373_v40 = vld [vmem:[#allocation12 + $0x54] sm:$0xf0] }
 0x103   : > { %v644_v27 = vmul.f32 %v1502_v24, %v643_v26  ;;  %v1330_v26 = vld [vmem:[#allocation12 + $0x70] sm:$0xf] }
 0x105   : > { %639 = vadd.xlane.f32.xlu0 %v634_v22  ;;  %v645_v28 = vadd.f32 %v1502_v24, %v644_v27  ;;  %v1377_v27 = vld [vmem:[#allocation12 + $0x74] sm:$0xf0] }
 0x106   : > { %766 = vmatpush.bf16.msra.mxu0 %v1358_v41  ;;  %v1372_v41 = vld [vmem:[#allocation12 + $0x54] sm:$0xf] }
 0x107   : > { %v2033_v29 = vsel %vm646_vm0, %v1502_v24, %v645_v28  ;;  %v1376_v28 = vld [vmem:[#allocation12 + $0x74] sm:$0xf] }
 0x10a   : > { %767 = vmatpush.bf16.msra.mxu0 %v1357_v42  ;;  %v1315_v42 = vor.u32 %v1373_v40, %v1314_v39 }
 0x10e   : > { %768 = vmatpush.bf16.msra.mxu0 %v1356_v43  ;;  %v1316_v43 = vld [vmem:[#allocation12 + $0x58] sm:$0xf0] }
 0x112   : > { %769 = vmatpush.bf16.msra.mxu0 %v1355_v44  ;;  %v1319_v44 = vor.u32 %v1372_v41, %v1316_v43 }
 0x116   : > { %770 = vmatpush.bf16.msra.mxu0 %v1354_v46  ;;  %v1371_v46 = vld [vmem:[#allocation12 + $0x44] sm:$0xf0] }
 0x170   : > { %v638_v30 = vpop.xlane.xlu0 %637 }
 0x171   : > { %v648_v31 = vmul.f32 %v2033_v29, %v638_v30  ;;  %v1331_v30 = vor.u32 %v1377_v27, %v1330_v26 }
 0x173   : > { %v650_v32 = vsub.f32 %v633_v20, %v648_v31  ;;  %v1332_v31 = vld [vmem:[#allocation12 + $0x78] sm:$0xf0]  ;;  %936 = vmatpush.bf16.msra.mxu1 %v1331_v30 }
 0x174   : > { %v1499_v30 = vld [vmem:[%s2102_s7] ss:$0 sm:$0xff] }
 0x175   : > { %v652_v33 = vmul.f32 %v650_v32, %v650_v32 }
 0x177   : > { %654 = vadd.xlane.f32.xlu1 %v652_v33  ;;  %v1322_v33 = vld [vmem:[#allocation12 + $0x60] sm:$0xf] }
 0x178   : > { %v640_v34 = vpop.xlane.xlu0 %639 }
 0x179   : > { %v649_v35 = vmul.f32 %v2033_v29, %v640_v34  ;;  %v1375_v34 = vld [vmem:[#allocation12 + $0x64] sm:$0xf0] }
 0x17b   : > { %v651_v36 = vsub.f32 %v634_v22, %v649_v35  ;;  %v1374_v35 = vld [vmem:[#allocation12 + $0x64] sm:$0xf] }
 0x17d   : > { %v653_v37 = vmul.f32 %v651_v36, %v651_v36 }
 0x17f   : > { %656 = vadd.xlane.f32.xlu1 %v653_v37  ;;  %v1324_v37 = vld [vmem:[#allocation12 + $0x68] sm:$0xf0] }
 0x180   : > { %v1327_v38 = vor.u32 %v1374_v35, %v1324_v37  ;;  %v1500_v37 = vld [vmem:[%s2103_s8] ss:$0 sm:$0xff] }
 0x1ea   : > { %v655_v45 = vpop.xlane.xlu1 %654 }
 0x1eb   : > { %v658_v47 = vmul.f32 %v655_v45, %v2033_v29  ;;  %v1306_v45 = vld [vmem:[#allocation12 + $0x40] sm:$0xf] }
 0x1ed   : > { %v660_v48 = vadd.f32 1e-05, %v658_v47  ;;  %v1370_v47 = vld [vmem:[#allocation12 + $0x44] sm:$0xf] }
 0x1ef   : > { %1503 = vrsqrt.f32 %v660_v48  ;;  %vm668_vm2 = vweird.f32 %v660_v48 }
 0x1f2   : > { %v657_v49 = vpop.xlane.xlu1 %656 }
 0x1f3   : > { %v659_v50 = vmul.f32 %v657_v49, %v2033_v29  ;;  %v1308_v49 = vld [vmem:[#allocation12 + $0x48] sm:$0xf0] }
 0x1f5   : > { %v1504_v51 = vpop.eup %1503  ;;  %v661_v52 = vadd.f32 1e-05, %v659_v50  ;;  %v1311_v50 = vor.u32 %v1370_v47, %v1308_v49 }
 0x1f6   : > { %v663_v53 = vmul.f32 %v1504_v51, %v660_v48  ;;  %vm669_vm1 = vweird.f32 %v1504_v51  ;;  %v1307_v48 = vor.u32 %v1371_v46, %v1306_v45 }
 0x1f7   : > { %1505 = vrsqrt.f32 %v661_v52  ;;  %vm670_vm3 = vmor %vm668_vm2, %vm669_vm1  ;;  %vm678_vm5 = vweird.f32 %v661_v52 }
 0x1f8   : > { %v664_v54 = vmul.f32 %v1504_v51, %v663_v53  ;;  %v1368_v53 = vld [vmem:[#allocation12 + $0x34] sm:$0xf] }
 0x1fa   : > { %v665_v55 = vmul.f32 0.5, %v664_v54 }
 0x1fc   : > { %v666_v56 = vsub.f32 1.5, %v665_v55  ;;  %v1300_v55 = vld [vmem:[#allocation12 + $0x38] sm:$0xf0] }
 0x1fd   : > { %v1506_v57 = vpop.eup %1505 }
 0x1fe   : > { %v667_v58 = vmul.f32 %v1504_v51, %v666_v56  ;;  %v673_v59 = vmul.f32 %v1506_v57, %v661_v52  ;;  %vm679_vm4 = vweird.f32 %v1506_v57  ;;  %v1369_v52 = vld [vmem:[#allocation12 + $0x34] sm:$0xf0]  ;;  %v1303_v56 = vor.u32 %v1368_v53, %v1300_v55 }
 0x1ff   : > { %vm680_vm6 = vmor %vm678_vm5, %vm679_vm4 }
 0x200   : > { %v674_v60 = vmul.f32 %v1506_v57, %v673_v59  ;;  %v671_v63 = vsel %vm670_vm3, %v1504_v51, %v667_v58  ;;  %v1298_v51 = vld [vmem:[#allocation12 + $0x30] sm:$0xf]  ;;  %v1367_v58 = vld [vmem:[#allocation12 + $0x24] sm:$0xf0]  ;;  %v1366_v59 = vld [vmem:[#allocation12 + $0x24] sm:$0xf] }
 0x201   : > { %v685_v1 = vmul.f32 %v1496_v61, %v671_v63  ;;  %v1299_v54 = vor.u32 %v1369_v52, %v1298_v51  ;;  %v1282_v63 = vld [vmem:[#allocation12 + $0x10] sm:$0xf] }
 0x202   : > { %v675_v62 = vmul.f32 0.5, %v674_v60 }
 0x203   : > { %v687_v5 = vmul.f32 %v685_v1, %v650_v32  ;;  %v1335_v32 = vor.u32 %v1376_v28, %v1332_v31  ;;  %v1364_v1 = vld [vmem:[#allocation12 + $0x14] sm:$0xf] }
 0x204   : > { %v676_v0 = vsub.f32 1.5, %v675_v62 }
 0x205   : > { %v2039_v8 = vadd.f32 %v1497_v6, %v687_v5  ;;  %950 = vmatpush.bf16.msra.mxu2 %v1335_v32  ;;  %v1363_v5 = vld [vmem:[#allocation12 + $0x4] sm:$0xf0] }
 0x206   : > { %v677_v2 = vmul.f32 %v1506_v57, %v676_v0  ;;  %v1365_v0 = vld [vmem:[#allocation12 + $0x14] sm:$0xf0] }
 0x208   : > { %v681_v3 = vsel %vm680_vm6, %v1506_v57, %v677_v2  ;;  %v1290_v57 = vld [vmem:[#allocation12 + $0x20] sm:$0xf]  ;;  %v1283_v2 = vor.u32 %v1365_v0, %v1282_v63 }
 0x209   : > { %v686_v4 = vmul.f32 %v1496_v61, %v681_v3  ;;  %951 = vmatpush.bf16.msra.mxu2 %v1327_v38  ;;  %v1291_v60 = vor.u32 %v1367_v58, %v1290_v57  ;;  %v1292_v61 = vld [vmem:[#allocation12 + $0x28] sm:$0xf0]  ;;  %v1284_v3 = vld [vmem:[#allocation12 + $0x18] sm:$0xf0] }
 0x20a   : > { %v1295_v62 = vor.u32 %v1366_v59, %v1292_v61 }
 0x20b   : > { %v688_v7 = vmul.f32 %v686_v4, %v651_v36  ;;  %v1323_v36 = vor.u32 %v1375_v34, %v1322_v33  ;;  %v1274_v4 = vld [vmem:[#allocation12] sm:$0xf] }
 0x20d   : > { %v2041_v9 = vadd.f32 %v1497_v6, %v688_v7  ;;  %937 = vmatpush.bf16.msra.mxu1 %v1323_v36  ;;  %952 = vmatpush.bf16.msra.mxu2 %v1319_v44  ;;  %v1287_v7 = vor.u32 %v1364_v1, %v1284_v3 }
 0x20f   : > { %v694_v10 = vpack.c.bf16 %v2041_v9, %v2039_v8 }
 0x211   : > { %771 = vmatmul.bf16.vlgmr.msra.gmra.mxu0 %v694_v10  ;;  %938 = vmatpush.bf16.msra.mxu1 %v1315_v42  ;;  %v1362_v10 = vld [vmem:[#allocation12 + $0x4] sm:$0xf] }
 0x212   : > { %953 = vmatpush.bf16.msra.mxu2 %v1311_v50 }
 0x215   : > { %939 = vmatpush.bf16.msra.mxu1 %v1307_v48 }
 0x216   : > { %954 = vmatpush.bf16.msra.mxu2 %v1303_v56 }
 0x219   : > { %940 = vmatpush.bf16.msra.mxu1 %v1299_v54 }
 0x21a   : > { %955 = vmatpush.bf16.msra.mxu2 %v1295_v62 }
 0x21d   : > { %941 = vmatpush.bf16.msra.mxu1 %v1291_v60 }
 0x21e   : > { %956 = vmatpush.bf16.msra.mxu2 %v1287_v7 }
 0x221   : > { %942 = vmatpush.bf16.msra.mxu1 %v1283_v2 }
 0x28e   : > { %v772_v12 = vpop.f32.mrf.mxu0 }
 0x28f   : > { %v773_v13 = vadd.f32 %v1498_v11, %v772_v12 }
 0x291   : > { %v777_v14 = vmax.f32 %v773_v13, 0.0  ;;  %v1275_v13 = vor.u32 %v1363_v5, %v1274_v4 }
 0x293   : > { %781 = vadd.xlane.f32.xlu2 %v777_v14  ;;  %943 = vmatpush.bf16.msra.mxu1 %v1275_v13 }
 0x296   : > { %v774_v15 = vpop.f32.mrf.mxu0 }
 0x297   : > { %v775_v16 = vadd.f32 %v1498_v11, %v774_v15  ;;  %v1276_v11 = vld [vmem:[#allocation12 + $0x8] sm:$0xf0] }
 0x298   : > { %v1279_v15 = vor.u32 %v1362_v10, %v1276_v11 }
 0x299   : > { %v778_v17 = vmax.f32 %v775_v16, 0.0 }
 0x29a   : > { %957 = vmatpush.bf16.msra.mxu2 %v1279_v15 }
 0x29b   : > { %783 = vadd.xlane.f32.xlu2 %v778_v17 }
 0x306   : > { %v782_v18 = vpop.xlane.xlu2 %781 }
 0x307   : > { %v785_v19 = vmul.f32 %v782_v18, %v2033_v29 }
 0x309   : > { %v2049_v20 = vsub.f32 %v777_v14, %v785_v19 }
 0x30b   : > { %v789_v21 = vmul.f32 %v2049_v20, %v2049_v20 }
 0x30d   : > { %791 = vadd.xlane.f32.xlu0 %v789_v21 }
 0x30e   : > { %v784_v22 = vpop.xlane.xlu2 %783 }
 0x30f   : > { %v786_v23 = vmul.f32 %v784_v22, %v2033_v29 }
 0x311   : > { %v2054_v24 = vsub.f32 %v778_v17, %v786_v23 }
 0x313   : > { %v790_v25 = vmul.f32 %v2054_v24, %v2054_v24 }
 0x315   : > { %793 = vadd.xlane.f32.xlu1 %v790_v25 }
 0x380   : > { %v792_v6 = vpop.xlane.xlu0 %791 }
 0x381   : > { %v795_v12 = vmul.f32 %v792_v6, %v2033_v29 }
 0x383   : > { %v797_v14 = vadd.f32 1e-05, %v795_v12 }
 0x385   : > { %1507 = vrsqrt.f32 %v797_v14  ;;  %vm805_vm8 = vweird.f32 %v797_v14 }
 0x388   : > { %v794_v16 = vpop.xlane.xlu1 %793 }
 0x389   : > { %v796_v17 = vmul.f32 %v794_v16, %v2033_v29 }
 0x38b   : > { %v1508_v18 = vpop.eup %1507  ;;  %v798_v19 = vadd.f32 1e-05, %v796_v17 }
 0x38c   : > { %v800_v21 = vmul.f32 %v1508_v18, %v797_v14  ;;  %vm806_vm7 = vweird.f32 %v1508_v18 }
 0x38d   : > { %1509 = vrsqrt.f32 %v798_v19  ;;  %vm807_vm9 = vmor %vm805_vm8, %vm806_vm7  ;;  %vm815_vm11 = vweird.f32 %v798_v19 }
 0x38e   : > { %v801_v22 = vmul.f32 %v1508_v18, %v800_v21 }
 0x390   : > { %v802_v23 = vmul.f32 0.5, %v801_v22 }
 0x392   : > { %v803_v25 = vsub.f32 1.5, %v802_v23 }
 0x393   : > { %v1510_v26 = vpop.eup %1509 }
 0x394   : > { %v804_v27 = vmul.f32 %v1508_v18, %v803_v25  ;;  %v810_v28 = vmul.f32 %v1510_v26, %v798_v19  ;;  %vm816_vm10 = vweird.f32 %v1510_v26 }
 0x395   : > { %vm817_vm12 = vmor %vm815_vm11, %vm816_vm10 }
 0x396   : > { %v808_v31 = vsel %vm807_vm9, %v1508_v18, %v804_v27  ;;  %v811_v32 = vmul.f32 %v1510_v26, %v810_v28 }
 0x397   : > { %v822_v33 = vmul.f32 %v1499_v30, %v808_v31 }
 0x398   : > { %v812_v29 = vmul.f32 0.5, %v811_v32 }
 0x399   : > { %v824_v36 = vmul.f32 %v822_v33, %v2049_v20  ;;  %v850_v20 = vld [vmem:[%s2105_s10] sm:$0x3] }
 0x39a   : > { %v813_v34 = vsub.f32 1.5, %v812_v29  ;;  %v852_v46 = vperm.slane %v850_v20, 0  ;;  %v853_v50 = vperm.slane %v850_v20, 1 }
 0x39b   : > { %v829_v41 = vadd.f32 %v1500_v37, %v824_v36 }
 0x39c   : > { %v814_v35 = vmul.f32 %v1510_v26, %v813_v34 }
 0x39d   : > { %v831_v43 = vadd.f32 %v829_v41, %v2039_v8 }
 0x39e   : > { %v818_v38 = vsel %vm817_vm12, %v1510_v26, %v814_v35 }
 0x39f   : > { %v823_v39 = vmul.f32 %v1499_v30, %v818_v38 }
 0x3a1   : > { %v825_v40 = vmul.f32 %v823_v39, %v2054_v24 }
 0x3a3   : > { %v830_v42 = vadd.f32 %v1500_v37, %v825_v40 }
 0x3a5   : > { %v832_v44 = vadd.f32 %v830_v42, %v2041_v9 }
 0x3a7   : > { %v833_v45 = vpack.c.bf16 %v832_v44, %v831_v43 }
 0x3a9   : > { %944 = vmatmul.bf16.vlgmr.msra.gmra.mxu1 %v833_v45  ;;  %958 = vmatmul.bf16.vlgmr.msra.gmra.mxu2 %v833_v45 }
 0x426   : > { %v945_v47 = vpop.f32.mrf.mxu1 }
 0x427   : > { %v946_v48 = vadd.f32 %v945_v47, %v852_v46 }
 0x429   : > { %v1336_v49 = vmul.f32 -1.442695, %v946_v48 }
 0x42b   : > { %1511 = vpow2.f32 %v1336_v49 }
 0x42c   : > { %v959_v24 = vpop.f32.mrf.mxu2 }
 0x42d   : > { %v960_v51 = vadd.f32 %v959_v24, %v853_v50 }
 0x42e   : > { %v947_v52 = vpop.f32.mrf.mxu1 }
 0x42f   : > { %v1337_v53 = vmul.f32 -1.442695, %v960_v51  ;;  %v948_v8 = vadd.f32 %v947_v52, %v852_v46 }
 0x431   : > { %v1512_v54 = vpop.eup %1511  ;;  %1513 = vpow2.f32 %v1337_v53  ;;  %v1338_v9 = vmul.f32 -1.442695, %v948_v8 }
 0x432   : > { %v976_v55 = vadd.f32 1.0, %v1512_v54 }
 0x433   : > { %1515 = vpow2.f32 %v1338_v9 }
 0x434   : > { %1517 = vrcp.f32 %v976_v55  ;;  %v961_v56 = vpop.f32.mrf.mxu2  ;;  %v991_v2 = vand.u32 2147483648, %v976_v55  ;;  %v989_v5 = vand.u32 2147483647, %v976_v55  ;;  %vm985_vm14 = vweird.f32 %v976_v55 }
 0x435   : > { %v962_v57 = vadd.f32 %v961_v56, %v853_v50 }
 0x436   : > { %v992_v12 = vor.u32 1.1754944e-38, %v991_v2  ;;  %vm990_vm0 = vcmp.eq.f32.partialorder %v989_v5, 8.507059e+37 }
 0x437   : > { %v1514_v58 = vpop.eup %1513  ;;  %v1339_v59 = vmul.f32 -1.442695, %v962_v57 }
 0x438   : > { %v977_v60 = vadd.f32 1.0, %v1514_v58 }
 0x439   : > { %v1516_v61 = vpop.eup %1515  ;;  %1519 = vpow2.f32 %v1339_v59 }
 0x43a   : > { %v1518_v62 = vpop.eup %1517  ;;  %1521 = vrcp.f32 %v977_v60  ;;  %v978_v0 = vadd.f32 1.0, %v1516_v61  ;;  %v1006_v17 = vand.u32 2147483648, %v977_v60  ;;  %v1004_v21 = vand.u32 2147483647, %v977_v60 }
 0x43b   : > { %v981_v63 = vmul.f32 %v1518_v62, %v976_v55  ;;  %vm986_vm13 = vweird.f32 %v1518_v62  ;;  %vm1000_vm2 = vweird.f32 %v977_v60 }
 0x43c   : > { %1523 = vrcp.f32 %v978_v0  ;;  %vm987_vm15 = vmor %vm985_vm14, %vm986_vm13  ;;  %v1021_v25 = vand.u32 2147483648, %v978_v0  ;;  %v1007_v27 = vor.u32 1.1754944e-38, %v1006_v17  ;;  %v1019_v30 = vand.u32 2147483647, %v978_v0 }
 0x43d   : > { %v982_v1 = vsub.f32 1.0, %v981_v63  ;;  %vm1005_vm5 = vcmp.eq.f32.partialorder %v1004_v21, 8.507059e+37  ;;  %vm1015_vm6 = vweird.f32 %v978_v0 }
 0x43e   : > { %v1022_v34 = vor.u32 1.1754944e-38, %v1021_v25  ;;  %vm1020_vm8 = vcmp.eq.f32.partialorder %v1019_v30, 8.507059e+37 }
 0x43f   : > { %v1520_v3 = vpop.eup %1519  ;;  %v983_v4 = vmul.f32 %v1518_v62, %v982_v1 }
 0x440   : > { %v1522_v6 = vpop.eup %1521  ;;  %v979_v7 = vadd.f32 1.0, %v1520_v3 }
 0x441   : > { %v984_v10 = vadd.f32 %v1518_v62, %v983_v4  ;;  %v996_v11 = vmul.f32 %v1522_v6, %v977_v60  ;;  %vm1001_vm1 = vweird.f32 %v1522_v6 }
 0x442   : > { %1525 = vrcp.f32 %v979_v7  ;;  %v1524_v13 = vpop.eup %1523  ;;  %vm1002_vm3 = vmor %vm1000_vm2, %vm1001_vm1  ;;  %v1036_v37 = vand.u32 2147483648, %v979_v7  ;;  %v1034_v40 = vand.u32 2147483647, %v979_v7  ;;  %vm1030_vm10 = vweird.f32 %v979_v7 }
 0x443   : > { %v988_v14 = vsel %vm987_vm15, %v1518_v62, %v984_v10  ;;  %v997_v15 = vsub.f32 1.0, %v996_v11  ;;  %v1011_v18 = vmul.f32 %v1524_v13, %v978_v0  ;;  %vm1016_vm4 = vweird.f32 %v1524_v13 }
 0x444   : > { %v993_v16 = vsel %vm990_vm0, %v992_v12, %v988_v14  ;;  %vm1017_vm7 = vmor %vm1015_vm6, %vm1016_vm4  ;;  %v1037_v42 = vor.u32 1.1754944e-38, %v1036_v37  ;;  %vm1035_vm12 = vcmp.eq.f32.partialorder %v1034_v40, 8.507059e+37 }
 0x445   : > { %1040 = vst [vmem:[#allocation14] sm:$0xff] %v993_v16  ;;  %v998_v19 = vmul.f32 %v1522_v6, %v997_v15  ;;  %v1012_v22 = vsub.f32 1.0, %v1011_v18 }
 0x447   : > { %v999_v23 = vadd.f32 %v1522_v6, %v998_v19  ;;  %v1013_v28 = vmul.f32 %v1524_v13, %v1012_v22 }
 0x448   : > { %v1526_v26 = vpop.eup %1525 }
 0x449   : > { %v1003_v31 = vsel %vm1002_vm3, %v1522_v6, %v999_v23  ;;  %v1026_v32 = vmul.f32 %v1526_v26, %v979_v7  ;;  %v1014_v33 = vadd.f32 %v1524_v13, %v1013_v28  ;;  %vm1031_vm9 = vweird.f32 %v1526_v26 }
 0x44a   : > { %v1008_v29 = vsel %vm1005_vm5, %v1007_v27, %v1003_v31  ;;  %vm1032_vm11 = vmor %vm1030_vm10, %vm1031_vm9 }
 0x44b   : > { %1041 = vst [vmem:[#allocation14 + $0x8] sm:$0xff] %v1008_v29  ;;  %v1027_v35 = vsub.f32 1.0, %v1026_v32  ;;  %v1018_v36 = vsel %vm1017_vm7, %v1524_v13, %v1014_v33 }
 0x44c   : > { %v1023_v38 = vsel %vm1020_vm8, %v1022_v34, %v1018_v36 }
 0x44d   : > { %v1028_v39 = vmul.f32 %v1526_v26, %v1027_v35  ;;  %1042 = vst [vmem:[#allocation14 + $0x10] sm:$0xff] %v1023_v38 }
 0x44f   : > { %v1029_v41 = vadd.f32 %v1526_v26, %v1028_v39 }
 0x451   : > { %v1033_v43 = vsel %vm1032_vm11, %v1526_v26, %v1029_v41 }
 0x452   : > { %v1038_v44 = vsel %vm1035_vm12, %v1037_v42, %v1033_v43 }
 0x453   : > { %1043 = vst [vmem:[#allocation14 + $0x18] sm:$0xff] %v1038_v44 }
 0x454 PF: > { %p1431_p3 = scmp.eq.s32.totalorder %s1910_s23, 2  ;;  %s2134_s3 = sld [smem:[#allocation29_spill]] }
 0x455   : > { %s1818_s27 = smov [#allocation14]   ;;  %s1819_s12 = smov 256  }
 0x456   : > { %s1053_s4 = sshll.u32 %s1818_s27, 4  ;;  %s1820_s0 = smov 16   ;;  %s1054_s4 = int_to_ptr.vmem [resolvable:$true] %s1053_s4 }
 0x45a   : > { %s1055_s5 = sshll.u32 %s2134_s3, 4  ;;  %s1056_s5 = int_to_ptr.hbm [resolvable:$true] %s1055_s5 }
 0x45b   : > { %1399 = dma.vmem_to_hbm [thread:$0]  (%p1431_p3), %s1054_s4, 512, %s1056_s5, [#allocation5], %s1819_s12, %s1819_s12, %s1820_s0  }
 0x45c   : > { %1780 = dma.done.wait (%p1431_p3), [#allocation5], 512  }
 0x45d   : > { %1782 = vsyncadd (%p1431_p3), [#allocation5], 4294966784 }
 0x45e PF: > { %s30_s22 = sadd.s32 1, %s1805_s22   ;;  %s2135_s9 = sld [smem:[#allocation21_spill]] }
 0x45f   : > { %p27_p4 = scmp.ge.s32.totalorder %s30_s22, 5   ;;  %s2136_s19 = sld [smem:[#allocation23_spill]] }
 0x460   : > { %s2137_s23 = sld [smem:[#allocation22_spill]]  ;;  %s2138_s17 = smov %s1789_s18 }
 0x461   : > { %s2140_s20 = smov %s1801_s21 }
 0x462   :  { %29 = sbr.rel (!%p27_p4) target bundleno = 16 (0x10), region = 139 }
 0x464   : > { %s2139_s18 = smov %s2135_s9 }
 0x466   : > { %s2141_s21 = smov %s2137_s23 }
 0x467   :  { %1072 = vsyncpa [#allocation4], 1 }
 0x468   :  { %1074 = vsyncpa [#allocation4 + $0x1], 1 }
 0x469   :  { %1075 = vsyncpa [#allocation7], 1 }
 0x46a   :  { %1077 = vsyncpa [#allocation7 + $0x1], 1 }
 0x46b   :  { %1078 = vsyncpa [#allocation10], 1 }
 0x46c   :  { %1079 = vsyncpa [#allocation13], 1 }
 0x46d   :  { %1080 = vsyncpa [#allocation5], 1 }
 0x46e   :  { %1082 = vsyncpa [#allocation5 + $0x1], 1 }

// kernel: tpu_custom_call.1
= control target key start
LH: loop header
LB: loop body
LE: loop exit
PB: predicated region body
PF: predicated region fallthrough
CT: control target
= control target key end

     0   :  { %s2095_s0 = inlined_call_operand.hbm [shape: bf16[16,384], index: 0, kind: input, shape index: {}]   ;;  %s2096_s1 = inlined_call_operand.hbm [shape: bf16[384,128], index: 1, kind: input, shape index: {}]   ;;  %s2097_s2 = inlined_call_operand.vmem [shape: f32[1,128], index: 2, kind: input, shape index: {}]   ;;  %s2098_s3 = inlined_call_operand.hbm [shape: f32[1,128], index: 3, kind: input, shape index: {}]   ;;  %s2099_s4 = inlined_call_operand.hbm [shape: f32[1,128], index: 4, kind: input, shape index: {}]   ;;  %s2100_s5 = inlined_call_operand.hbm [shape: bf16[128,128], index: 5, kind: input, shape index: {}]   ;;  %s2101_s6 = inlined_call_operand.vmem [shape: f32[1,128], index: 6, kind: input, shape index: {}]   ;;  %s2102_s7 = inlined_call_operand.vmem [shape: f32[1,128], index: 7, kind: input, shape index: {}]   ;;  %s2103_s8 = inlined_call_operand.vmem [shape: f32[1,128], index: 8, kind: input, shape index: {}]   ;;  %s2104_s9 = inlined_call_operand.hbm [shape: bf16[128,256], index: 9, kind: input, shape index: {}]   ;;  %s2105_s10 = inlined_call_operand.vmem [shape: f32[1,256], index: 10, kind: input, shape index: {}]   ;;  %s2106_s11 = inlined_call_operand.hbm [shape: f32[16,256], index: 11, kind: output, shape index: {}]  }
   0x1   :  { %2113 = sst [smem:[#allocation24_spill]] %s2095_s0 }
   0x2   :  { %2114 = sst [smem:[#allocation25_spill]] %s2098_s3 }
   0x3   :  { %2115 = sst [smem:[#allocation26_spill]] %s2099_s4 }
   0x4   :  { %2116 = sst [smem:[#allocation27_spill]] %s2100_s5 }
   0x5   :  { %2117 = sst [smem:[#allocation28_spill]] %s2104_s9 }
   0x6   :  { %2118 = sst [smem:[#allocation29_spill]] %s2106_s11 }
   0x7   :  { %16 = vsyncpa [#allocation4], 0 }
   0x8   :  { %18 = vsyncpa [#allocation4 + $0x1], 0 }
   0x9   :  { %19 = vsyncpa [#allocation7], 0 }
   0xa   :  { %21 = vsyncpa [#allocation7 + $0x1], 0 }
   0xb   :  { %22 = vsyncpa [#allocation10], 0 }
   0xc   :  { %23 = vsyncpa [#allocation13], 0 }
   0xd   :  { %24 = vsyncpa [#allocation5], 0  ;;  %s1881_s17 = smov 0   ;;  %s1883_s18 = smov 0  }
   0xe   :  { %s1885_s19 = smov 0   ;;  %s1887_s20 = smov 0  }
   0xf   :  { %s1889_s21 = smov 0   ;;  %s1891_s22 = smov 0  }
  0x10 LB: > { %2119 = sst [smem:[#allocation21_spill]] %s1793_s19  ;;  %s1910_s23 = sadd.s32 4294967295, %s1805_s22   ;;  %s1805_s22 = sphi %s1891_s22, %s30_s22   ;;  %s1801_s21 = sphi %s1889_s21, %s2141_s21   ;;  %s1797_s20 = sphi %s1887_s20, %s2140_s20   ;;  %s1793_s19 = sphi %s1885_s19, %s2136_s19   ;;  %s1789_s18 = sphi %s1883_s18, %s2139_s18   ;;  %s1785_s17 = sphi %s1881_s17, %s2138_s17  }
  0x11   : > { %p64_p0 = scmp.ne.s32.totalorder %s1789_s18, %s1785_s17  ;;  %p65_p1 = scmp.eq.s32.totalorder %s1910_s23, 0 }
  0x12   : > { %p1184_p2 = scmp.ge.s32.totalorder %s1805_s22, 1  ;;  %p316_p3 = scmp.lt.s32.totalorder %s1805_s22, 4 }
  0x13   : > { %p1918_p4 = por %p65_p1, %p64_p0  ;;  %s2121_s3 = sld [smem:[#allocation25_spill]] }
  0x14   : > { %p1925_p5 = pnand %p1184_p2, %p316_p3  ;;  %s1807_s29 = smov [#allocation8]  }
  0x15   : > { %s333_s30 = sshll.u32 %s1807_s29, 4  ;;  %s2123_s4 = sld [smem:[#allocation26_spill]]  ;;  %s334_s30 = int_to_ptr.vmem [resolvable:$true] %s333_s30 }
  0x16   : > { %p1402_p6 = pneg %p1925_p5  ;;  %s2125_s5 = sld [smem:[#allocation27_spill]] }
  0x17   : > { %s1808_s26 = smov [#allocation9]   ;;  %s1809_s12 = smov [#allocation11]  }
  0x18   : > { %p1936_p7 = pnand %p1402_p6, %p65_p1  ;;  %s345_s29 = sshll.u32 %s1808_s26, 4  ;;  %s346_s29 = int_to_ptr.vmem [resolvable:$true] %s345_s29 }
  0x19   : > { %s331_s27 = sshll.u32 %s2121_s3, 4  ;;  %s356_s13 = sshll.u32 %s1809_s12, 4  ;;  %s332_s27 = int_to_ptr.hbm [resolvable:$true] %s331_s27  ;;  %s357_s13 = int_to_ptr.vmem [resolvable:$true] %s356_s13 }
  0x1a   : > { %1405 = dma.hbm_to_vmem [thread:$0]  (!%p1936_p7), %s332_s27, 16, %s334_s30, [#allocation7]  }
  0x1b   : > { %s343_s14 = sshll.u32 %s2123_s4, 4  ;;  %s2126_s9 = sld [smem:[#allocation28_spill]]  ;;  %s344_s14 = int_to_ptr.hbm [resolvable:$true] %s343_s14 }
  0x1c   : > { %s354_s25 = sshll.u32 %s2125_s5, 4  ;;  %s2107_s17 = smov 64   ;;  %s355_s25 = int_to_ptr.hbm [resolvable:$true] %s354_s25 }
  0x1d   : > { %1408 = dma.hbm_to_vmem [thread:$0]  (!%p1936_p7), %s344_s14, 16, %s346_s29, [#allocation10]  }
  0x1e   : > { %s2109_s27 = smov 4   ;;  %s1812_s30 = smov [#allocation12]  }
  0x1f   : > { %1411 = dma.hbm_to_vmem [thread:$0]  (!%p1936_p7), %s355_s25, 1024, %s357_s13, [#allocation10], %s2107_s17, %s2107_s17, %s2109_s27  }
  0x20   : > { %s379_s14 = sshll.u32 %s1812_s30, 4  ;;  %s1813_s26 = smov 128   ;;  %s380_s14 = int_to_ptr.vmem [resolvable:$true] %s379_s14 }
  0x21   : > { %s377_s16 = sshll.u32 %s2126_s9, 4  ;;  %s1814_s3 = smov 8   ;;  %s378_s16 = int_to_ptr.hbm [resolvable:$true] %s377_s16 }
  0x22   : > { %1414 = dma.hbm_to_vmem [thread:$0]  (!%p1936_p7), %s378_s16, 2048, %s380_s14, [#allocation13], %s1813_s26, %s1813_s26, %s1814_s3  }
  0x23   : > { %s39_s4 = sadd.s32 1, %s1801_s21  ;;  %s51_s29 = sadd.s32 1, %s1793_s19 }
  0x24   : > { %p40_p8 = scmp.ge.s32.totalorder %s39_s4, 3  ;;  %p58_p9 = scmp.ne.s32.totalorder %s1793_s19, %s1789_s18 }
  0x25   : > { %p59_p10 = scmp.eq.s32.totalorder %s1805_s22, 0  ;;  %p1426_p11 = scmp.lt.s32.totalorder %s1805_s22, 3 }
  0x26   : > { %s2143_s4 = smov (%p40_p8, %s39_s4), 0  ;;  %s396_s12 = sand.u32 1, %s1793_s19  }
  0x27   : > { %2127 = sst [smem:[#allocation22_spill]] %s2143_s4  ;;  %p1965_p12 = por %p59_p10, %p58_p9 }
  0x28   : > { %s47_s13 = ssub.s32 %s1801_s21, %s2143_s4  ;;  %s1190_s15 = sshll.u32 %s396_s12, 3 }
  0x29   : > { %p49_p13 = scmp.eq.s32.totalorder %s47_s13, 0  ;;  %s1191_s16 = sshll.u32 %s1801_s21, 2 }
  0x2a   : > { %s2130_s0 = sld [smem:[#allocation24_spill]]  ;;  %s400_s17 = scalar_lea.vmem [#allocation3], %s1190_s15 }
  0x2b   : > { %s1974_s30 = scalar_select %p49_p13, %s1793_s19, %s51_s29  }
  0x2c   : > { %s410_s27 = sshll.u32 %s400_s17, 4  ;;  %p1983_p0 = pnand %p1426_p11, %p1965_p12  ;;  %s411_s27 = int_to_ptr.vmem [resolvable:$true] %s410_s27 }
  0x2d   : > { %2129 = sst [smem:[#allocation23_spill]] %s1974_s30  ;;  %s420_s13 = sand.u32 1, %s1805_s22  }
  0x2e   : > { %s397_s29 = scalar_lea.sflag [#allocation4], %s396_s12  ;;  %s1815_s4 = smov 192  }
  0x2f   : > { %s2132_s30 = smov 4   ;;  %s2133_s14 = smov 64  }
  0x30   : > { %s407_s3 = scalar_lea.hbm %s2130_s0, %s1191_s16  ;;  %s1192_s15 = sshll.u32 %s396_s12, 6 }
  0x31   : > { %s408_s5 = sshll.u32 %s407_s3, 4  ;;  %s1344_s17 = sshll.u32 %s1801_s21, 6  ;;  %s409_s5 = int_to_ptr.hbm [resolvable:$true] %s408_s5 }
  0x32   : > { %1418 = dma.hbm_to_vmem [thread:$0]  (!%p1983_p0), %s409_s5, 128, %s411_s27, %s397_s29, %s1815_s4, %s2133_s14, %s2132_s30  }
  0x33   : > { %s429_s25 = scalar_lea.hbm %s2096_s1, %s1344_s17  ;;  %s424_s0 = scalar_lea.vmem [#allocation6], %s1192_s15 }
  0x34   : > { %s430_s3 = sshll.u32 %s429_s25, 4  ;;  %s432_s19 = sshll.u32 %s424_s0, 4  ;;  %s431_s3 = int_to_ptr.hbm [resolvable:$true] %s430_s3  ;;  %s433_s19 = int_to_ptr.vmem [resolvable:$true] %s432_s19 }
  0x35   : > { %s421_s11 = scalar_lea.sflag [#allocation7], %s420_s13  ;;  %444 = sbr.rel (%p1925_p5) target bundleno = 1118 (0x45e), region = 64 }
  0x36   : > { %1421 = dma.hbm_to_vmem [thread:$0]  (!%p1983_p0), %s431_s3, 1024, %s433_s19, %s421_s11, %s2133_s14, %s2133_s14, %s2132_s30  }
  0x37   : > { %s446_s5 = sand.u32 (!%p1925_p5), 1, %s1789_s18  }
  0x38   : > { %s1196_s27 = sshll.u32 (!%p1925_p5), %s446_s5, 3  ;;  %s447_s4 = scalar_lea.sflag (!%p1925_p5), [#allocation4], %s446_s5 }
  0x39   : > { %s2004_s12 = scalar_lea.vmem (!%p1925_p5), [#allocation3], %s1196_s27 }
  0x3a   : > { %1760 = dma.done.wait (%p1918_p4), %s447_s4, 128  }
  0x3b   : > { %1762 = vsyncadd (%p1918_p4), %s447_s4, 4294967168  ;;  %s456_s0 = sand.u32 1, %s1910_s23   ;;  %s1197_s9 = sshll.u32 %s446_s5, 6 }
  0x3c   : > { %s457_s11 = scalar_lea.sflag [#allocation7], %s456_s0  ;;  %s460_s19 = scalar_lea.vmem [#allocation6], %s1197_s9 }
  0x3d   : > { %1764 = dma.done.wait (%p1918_p4), %s457_s11, 1024  }
  0x3e   : > { %1766 = vsyncadd (%p1918_p4), %s457_s11, 4294966272 }
  0x3f   : > { %1768 = dma.done.wait (%p65_p1), [#allocation7], 16  }
  0x40   : > { %1770 = vsyncadd (%p65_p1), [#allocation7], 4294967280 }
  0x41   : > { %1772 = dma.done.wait (%p65_p1), [#allocation10], 1040  }
  0x42   : > { %1774 = vsyncadd (%p65_p1), [#allocation10], 4294966256 }
  0x43   : > { %1776 = dma.done.wait (%p65_p1), [#allocation13], 2048  }
  0x44   : > { %1778 = vsyncadd (%p65_p1), [#allocation13], 4294965248  ;;  %p1202_p2 = scmp.ne.s32.totalorder %s1797_s20, 0 }
  0x46   : > { %526 = sbr.rel (%p1202_p2) target bundleno = 78 (0x4e), region = 92 }
  0x4b   : > { %v1816_v0 = vmov 0.0  }
  0x4c   : > { %527 = vst [vmem:[#allocation2] sm:$0xff] %v1816_v0 }
  0x4d   : > { %528 = vst [vmem:[#allocation2 + $0x8] sm:$0xff] %v1816_v0 }
  0x4e PF: > { %v1353_v1 = vld [vmem:[%s460_s19 + $0x38] sm:$0xff]  ;;  %v1352_v2 = vld [vmem:[%s460_s19 + $0x30] sm:$0xff]  ;;  %v1351_v3 = vld [vmem:[%s460_s19 + $0x28] sm:$0xff]  ;;  %p1239_p1 = scmp.ne.s32.totalorder %s1797_s20, 2 }
  0x4f   : > { %603 = vmatpush.bf16.msra.mxu0 %v1353_v1  ;;  %v1350_v4 = vld [vmem:[%s460_s19 + $0x20] sm:$0xff]  ;;  %v1349_v5 = vld [vmem:[%s460_s19 + $0x18] sm:$0xff]  ;;  %v1348_v6 = vld [vmem:[%s460_s19 + $0x10] sm:$0xff] }
  0x50   : > { %v1347_v7 = vld [vmem:[%s460_s19 + $0x8] sm:$0xff]  ;;  %v1346_v8 = vld [vmem:[%s460_s19] sm:$0xff]  ;;  %v1345_v9 = vld [vmem:[%s2004_s12] sm:$0xff] }
  0x53   : > { %604 = vmatpush.bf16.msra.mxu0 %v1352_v2  ;;  %v529_v10 = vld [vmem:[#allocation2] sm:$0xff] }
  0x54   : > { %v530_v13 = vld [vmem:[#allocation2 + $0x8] sm:$0xff] }
  0x57   : > { %605 = vmatpush.bf16.msra.mxu0 %v1351_v3 }
  0x5b   : > { %606 = vmatpush.bf16.msra.mxu0 %v1350_v4 }
  0x5f   : > { %607 = vmatpush.bf16.msra.mxu0 %v1349_v5 }
  0x63   : > { %608 = vmatpush.bf16.msra.mxu0 %v1348_v6 }
  0x67   : > { %609 = vmatpush.bf16.msra.mxu0 %v1347_v7 }
  0x6b   : > { %610 = vmatpush.bf16.msra.mxu0 %v1346_v8 }
  0x6e   : > { %611 = vmatmul.bf16.vlgmr.msra.gmra.mxu0 %v1345_v9 }
  0xeb   : > { %v612_v11 = vpop.f32.mrf.mxu0 }
  0xec   : > { %v617_v12 = vadd.f32 %v612_v11, %v529_v10 }
  0xee   : > { %619 = vst [vmem:[#allocation2] sm:$0xff] %v617_v12 }
  0xf2   : > { %624 = sbr.rel (%p1239_p1) target bundleno = 1108 (0x454), region = 96 }
  0xf3   : > { %v614_v14 = vpop.f32.mrf.mxu0 }
  0xf4   : > { %v618_v15 = vadd.f32 %v614_v14, %v530_v13 }
  0xf6   : > { %620 = vst [vmem:[#allocation2 + $0x8] sm:$0xff] %v618_v15 }
  0xf7   : > { %v625_v16 = vld [vmem:[#allocation2] sm:$0xff]  ;;  %v1817_v23 = vmov 128.0   ;;  %v1360_v39 = vld [vmem:[#allocation11 + $0x30] sm:$0xff]  ;;  %v1359_v40 = vld [vmem:[#allocation11 + $0x28] sm:$0xff] }
  0xf8   : > { %v1495_v17 = vld [vmem:[%s2097_s2] ss:$0 sm:$0xff]  ;;  %1501 = vrcp.f32 %v1817_v23  ;;  %v1358_v41 = vld [vmem:[#allocation11 + $0x20] sm:$0xff]  ;;  %v1356_v43 = vld [vmem:[#allocation11 + $0x10] sm:$0xff] }
  0xf9   : > { %v631_v18 = vadd.f32 %v1495_v17, %v625_v16  ;;  %v1361_v38 = vld [vmem:[#allocation11 + $0x38] sm:$0xff]  ;;  %v1355_v44 = vld [vmem:[#allocation11 + $0x8] sm:$0xff]  ;;  %v1354_v46 = vld [vmem:[#allocation11] sm:$0xff] }
  0xfa   : > { %763 = vmatpush.bf16.msra.mxu0 %v1361_v38  ;;  %v1357_v42 = vld [vmem:[#allocation11 + $0x18] sm:$0xff] }
  0xfb   : > { %v633_v20 = vmax.f32 %v631_v18, 0.0  ;;  %v1496_v61 = vld [vmem:[#allocation8] ss:$0 sm:$0xff]  ;;  %v1497_v6 = vld [vmem:[#allocation9] ss:$0 sm:$0xff] }
  0xfc   : > { %v1498_v11 = vld [vmem:[%s2101_s6] ss:$0 sm:$0xff] }
  0xfd   : > { %v626_v19 = vld [vmem:[#allocation2 + $0x8] sm:$0xff]  ;;  %637 = vadd.xlane.f32.xlu0 %v633_v20 }
  0xfe   : > { %v632_v21 = vadd.f32 %v1495_v17, %v626_v19  ;;  %v1502_v24 = vpop.eup %1501  ;;  %764 = vmatpush.bf16.msra.mxu0 %v1360_v39  ;;  %v1314_v39 = vld [vmem:[#allocation12 + $0x50] sm:$0xf] }
  0xff   : > { %v642_v25 = vmul.f32 128.0, %v1502_v24  ;;  %vm646_vm0 = vweird.f32 %v1502_v24 }
 0x100   : > { %v634_v22 = vmax.f32 %v632_v21, 0.0 }
 0x101   : > { %v643_v26 = vsub.f32 1.0, %v642_v25 }
 0x102   : > { %765 = vmatpush.bf16.msra.mxu0 %v1359_v40  ;;  %v1373_v40 = vld [vmem:[#allocation12 + $0x54] sm:$0xf0] }
 0x103   : > { %v644_v27 = vmul.f32 %v1502_v24, %v643_v26  ;;  %v1330_v26 = vld [vmem:[#allocation12 + $0x70] sm:$0xf] }
 0x105   : > { %639 = vadd.xlane.f32.xlu0 %v634_v22  ;;  %v645_v28 = vadd.f32 %v1502_v24, %v644_v27  ;;  %v1377_v27 = vld [vmem:[#allocation12 + $0x74] sm:$0xf0] }
 0x106   : > { %766 = vmatpush.bf16.msra.mxu0 %v1358_v41  ;;  %v1372_v41 = vld [vmem:[#allocation12 + $0x54] sm:$0xf] }
 0x107   : > { %v2033_v29 = vsel %vm646_vm0, %v1502_v24, %v645_v28  ;;  %v1376_v28 = vld [vmem:[#allocation12 + $0x74] sm:$0xf] }
 0x10a   : > { %767 = vmatpush.bf16.msra.mxu0 %v1357_v42  ;;  %v1315_v42 = vor.u32 %v1373_v40, %v1314_v39 }
 0x10e   : > { %768 = vmatpush.bf16.msra.mxu0 %v1356_v43  ;;  %v1316_v43 = vld [vmem:[#allocation12 + $0x58] sm:$0xf0] }
 0x112   : > { %769 = vmatpush.bf16.msra.mxu0 %v1355_v44  ;;  %v1319_v44 = vor.u32 %v1372_v41, %v1316_v43 }
 0x116   : > { %770 = vmatpush.bf16.msra.mxu0 %v1354_v46  ;;  %v1371_v46 = vld [vmem:[#allocation12 + $0x44] sm:$0xf0] }
 0x170   : > { %v638_v30 = vpop.xlane.xlu0 %637 }
 0x171   : > { %v648_v31 = vmul.f32 %v2033_v29, %v638_v30  ;;  %v1331_v30 = vor.u32 %v1377_v27, %v1330_v26 }
 0x173   : > { %v650_v32 = vsub.f32 %v633_v20, %v648_v31  ;;  %v1332_v31 = vld [vmem:[#allocation12 + $0x78] sm:$0xf0]  ;;  %936 = vmatpush.bf16.msra.mxu1 %v1331_v30 }
 0x174   : > { %v1499_v30 = vld [vmem:[%s2102_s7] ss:$0 sm:$0xff] }
 0x175   : > { %v652_v33 = vmul.f32 %v650_v32, %v650_v32 }
 0x177   : > { %654 = vadd.xlane.f32.xlu1 %v652_v33  ;;  %v1322_v33 = vld [vmem:[#allocation12 + $0x60] sm:$0xf] }
 0x178   : > { %v640_v34 = vpop.xlane.xlu0 %639 }
 0x179   : > { %v649_v35 = vmul.f32 %v2033_v29, %v640_v34  ;;  %v1375_v34 = vld [vmem:[#allocation12 + $0x64] sm:$0xf0] }
 0x17b   : > { %v651_v36 = vsub.f32 %v634_v22, %v649_v35  ;;  %v1374_v35 = vld [vmem:[#allocation12 + $0x64] sm:$0xf] }
 0x17d   : > { %v653_v37 = vmul.f32 %v651_v36, %v651_v36 }
 0x17f   : > { %656 = vadd.xlane.f32.xlu1 %v653_v37  ;;  %v1324_v37 = vld [vmem:[#allocation12 + $0x68] sm:$0xf0] }
 0x180   : > { %v1327_v38 = vor.u32 %v1374_v35, %v1324_v37  ;;  %v1500_v37 = vld [vmem:[%s2103_s8] ss:$0 sm:$0xff] }
 0x1ea   : > { %v655_v45 = vpop.xlane.xlu1 %654 }
 0x1eb   : > { %v658_v47 = vmul.f32 %v655_v45, %v2033_v29  ;;  %v1306_v45 = vld [vmem:[#allocation12 + $0x40] sm:$0xf] }
 0x1ed   : > { %v660_v48 = vadd.f32 1e-05, %v658_v47  ;;  %v1370_v47 = vld [vmem:[#allocation12 + $0x44] sm:$0xf] }
 0x1ef   : > { %1503 = vrsqrt.f32 %v660_v48  ;;  %vm668_vm2 = vweird.f32 %v660_v48 }
 0x1f2   : > { %v657_v49 = vpop.xlane.xlu1 %656 }
 0x1f3   : > { %v659_v50 = vmul.f32 %v657_v49, %v2033_v29  ;;  %v1308_v49 = vld [vmem:[#allocation12 + $0x48] sm:$0xf0] }
 0x1f5   : > { %v1504_v51 = vpop.eup %1503  ;;  %v661_v52 = vadd.f32 1e-05, %v659_v50  ;;  %v1311_v50 = vor.u32 %v1370_v47, %v1308_v49 }
 0x1f6   : > { %v663_v53 = vmul.f32 %v1504_v51, %v660_v48  ;;  %vm669_vm1 = vweird.f32 %v1504_v51  ;;  %v1307_v48 = vor.u32 %v1371_v46, %v1306_v45 }
 0x1f7   : > { %1505 = vrsqrt.f32 %v661_v52  ;;  %vm670_vm3 = vmor %vm668_vm2, %vm669_vm1  ;;  %vm678_vm5 = vweird.f32 %v661_v52 }
 0x1f8   : > { %v664_v54 = vmul.f32 %v1504_v51, %v663_v53  ;;  %v1368_v53 = vld [vmem:[#allocation12 + $0x34] sm:$0xf] }
 0x1fa   : > { %v665_v55 = vmul.f32 0.5, %v664_v54 }
 0x1fc   : > { %v666_v56 = vsub.f32 1.5, %v665_v55  ;;  %v1300_v55 = vld [vmem:[#allocation12 + $0x38] sm:$0xf0] }
 0x1fd   : > { %v1506_v57 = vpop.eup %1505 }
 0x1fe   : > { %v667_v58 = vmul.f32 %v1504_v51, %v666_v56  ;;  %v673_v59 = vmul.f32 %v1506_v57, %v661_v52  ;;  %vm679_vm4 = vweird.f32 %v1506_v57  ;;  %v1369_v52 = vld [vmem:[#allocation12 + $0x34] sm:$0xf0]  ;;  %v1303_v56 = vor.u32 %v1368_v53, %v1300_v55 }
 0x1ff   : > { %vm680_vm6 = vmor %vm678_vm5, %vm679_vm4 }
 0x200   : > { %v674_v60 = vmul.f32 %v1506_v57, %v673_v59  ;;  %v671_v63 = vsel %vm670_vm3, %v1504_v51, %v667_v58  ;;  %v1298_v51 = vld [vmem:[#allocation12 + $0x30] sm:$0xf]  ;;  %v1367_v58 = vld [vmem:[#allocation12 + $0x24] sm:$0xf0]  ;;  %v1366_v59 = vld [vmem:[#allocation12 + $0x24] sm:$0xf] }
 0x201   : > { %v685_v1 = vmul.f32 %v1496_v61, %v671_v63  ;;  %v1299_v54 = vor.u32 %v1369_v52, %v1298_v51  ;;  %v1282_v63 = vld [vmem:[#allocation12 + $0x10] sm:$0xf] }
 0x202   : > { %v675_v62 = vmul.f32 0.5, %v674_v60 }
 0x203   : > { %v687_v5 = vmul.f32 %v685_v1, %v650_v32  ;;  %v1335_v32 = vor.u32 %v1376_v28, %v1332_v31  ;;  %v1364_v1 = vld [vmem:[#allocation12 + $0x14] sm:$0xf] }
 0x204   : > { %v676_v0 = vsub.f32 1.5, %v675_v62 }
 0x205   : > { %v2039_v8 = vadd.f32 %v1497_v6, %v687_v5  ;;  %950 = vmatpush.bf16.msra.mxu2 %v1335_v32  ;;  %v1363_v5 = vld [vmem:[#allocation12 + $0x4] sm:$0xf0] }
 0x206   : > { %v677_v2 = vmul.f32 %v1506_v57, %v676_v0  ;;  %v1365_v0 = vld [vmem:[#allocation12 + $0x14] sm:$0xf0] }
 0x208   : > { %v681_v3 = vsel %vm680_vm6, %v1506_v57, %v677_v2  ;;  %v1290_v57 = vld [vmem:[#allocation12 + $0x20] sm:$0xf]  ;;  %v1283_v2 = vor.u32 %v1365_v0, %v1282_v63 }
 0x209   : > { %v686_v4 = vmul.f32 %v1496_v61, %v681_v3  ;;  %951 = vmatpush.bf16.msra.mxu2 %v1327_v38  ;;  %v1291_v60 = vor.u32 %v1367_v58, %v1290_v57  ;;  %v1292_v61 = vld [vmem:[#allocation12 + $0x28] sm:$0xf0]  ;;  %v1284_v3 = vld [vmem:[#allocation12 + $0x18] sm:$0xf0] }
 0x20a   : > { %v1295_v62 = vor.u32 %v1366_v59, %v1292_v61 }
 0x20b   : > { %v688_v7 = vmul.f32 %v686_v4, %v651_v36  ;;  %v1323_v36 = vor.u32 %v1375_v34, %v1322_v33  ;;  %v1274_v4 = vld [vmem:[#allocation12] sm:$0xf] }
 0x20d   : > { %v2041_v9 = vadd.f32 %v1497_v6, %v688_v7  ;;  %937 = vmatpush.bf16.msra.mxu1 %v1323_v36  ;;  %952 = vmatpush.bf16.msra.mxu2 %v1319_v44  ;;  %v1287_v7 = vor.u32 %v1364_v1, %v1284_v3 }
 0x20f   : > { %v694_v10 = vpack.c.bf16 %v2041_v9, %v2039_v8 }
 0x211   : > { %771 = vmatmul.bf16.vlgmr.msra.gmra.mxu0 %v694_v10  ;;  %938 = vmatpush.bf16.msra.mxu1 %v1315_v42  ;;  %v1362_v10 = vld [vmem:[#allocation12 + $0x4] sm:$0xf] }
 0x212   : > { %953 = vmatpush.bf16.msra.mxu2 %v1311_v50 }
 0x215   : > { %939 = vmatpush.bf16.msra.mxu1 %v1307_v48 }
 0x216   : > { %954 = vmatpush.bf16.msra.mxu2 %v1303_v56 }
 0x219   : > { %940 = vmatpush.bf16.msra.mxu1 %v1299_v54 }
 0x21a   : > { %955 = vmatpush.bf16.msra.mxu2 %v1295_v62 }
 0x21d   : > { %941 = vmatpush.bf16.msra.mxu1 %v1291_v60 }
 0x21e   : > { %956 = vmatpush.bf16.msra.mxu2 %v1287_v7 }
 0x221   : > { %942 = vmatpush.bf16.msra.mxu1 %v1283_v2 }
 0x28e   : > { %v772_v12 = vpop.f32.mrf.mxu0 }
 0x28f   : > { %v773_v13 = vadd.f32 %v1498_v11, %v772_v12 }
 0x291   : > { %v777_v14 = vmax.f32 %v773_v13, 0.0  ;;  %v1275_v13 = vor.u32 %v1363_v5, %v1274_v4 }
 0x293   : > { %781 = vadd.xlane.f32.xlu2 %v777_v14  ;;  %943 = vmatpush.bf16.msra.mxu1 %v1275_v13 }
 0x296   : > { %v774_v15 = vpop.f32.mrf.mxu0 }
 0x297   : > { %v775_v16 = vadd.f32 %v1498_v11, %v774_v15  ;;  %v1276_v11 = vld [vmem:[#allocation12 + $0x8] sm:$0xf0] }
 0x298   : > { %v1279_v15 = vor.u32 %v1362_v10, %v1276_v11 }
 0x299   : > { %v778_v17 = vmax.f32 %v775_v16, 0.0 }
 0x29a   : > { %957 = vmatpush.bf16.msra.mxu2 %v1279_v15 }
 0x29b   : > { %783 = vadd.xlane.f32.xlu2 %v778_v17 }
 0x306   : > { %v782_v18 = vpop.xlane.xlu2 %781 }
 0x307   : > { %v785_v19 = vmul.f32 %v782_v18, %v2033_v29 }
 0x309   : > { %v2049_v20 = vsub.f32 %v777_v14, %v785_v19 }
 0x30b   : > { %v789_v21 = vmul.f32 %v2049_v20, %v2049_v20 }
 0x30d   : > { %791 = vadd.xlane.f32.xlu0 %v789_v21 }
 0x30e   : > { %v784_v22 = vpop.xlane.xlu2 %783 }
 0x30f   : > { %v786_v23 = vmul.f32 %v784_v22, %v2033_v29 }
 0x311   : > { %v2054_v24 = vsub.f32 %v778_v17, %v786_v23 }
 0x313   : > { %v790_v25 = vmul.f32 %v2054_v24, %v2054_v24 }
 0x315   : > { %793 = vadd.xlane.f32.xlu1 %v790_v25 }
 0x380   : > { %v792_v6 = vpop.xlane.xlu0 %791 }
 0x381   : > { %v795_v12 = vmul.f32 %v792_v6, %v2033_v29 }
 0x383   : > { %v797_v14 = vadd.f32 1e-05, %v795_v12 }
 0x385   : > { %1507 = vrsqrt.f32 %v797_v14  ;;  %vm805_vm8 = vweird.f32 %v797_v14 }
 0x388   : > { %v794_v16 = vpop.xlane.xlu1 %793 }
 0x389   : > { %v796_v17 = vmul.f32 %v794_v16, %v2033_v29 }
 0x38b   : > { %v1508_v18 = vpop.eup %1507  ;;  %v798_v19 = vadd.f32 1e-05, %v796_v17 }
 0x38c   : > { %v800_v21 = vmul.f32 %v1508_v18, %v797_v14  ;;  %vm806_vm7 = vweird.f32 %v1508_v18 }
 0x38d   : > { %1509 = vrsqrt.f32 %v798_v19  ;;  %vm807_vm9 = vmor %vm805_vm8, %vm806_vm7  ;;  %vm815_vm11 = vweird.f32 %v798_v19 }
 0x38e   : > { %v801_v22 = vmul.f32 %v1508_v18, %v800_v21 }
 0x390   : > { %v802_v23 = vmul.f32 0.5, %v801_v22 }
 0x392   : > { %v803_v25 = vsub.f32 1.5, %v802_v23 }
 0x393   : > { %v1510_v26 = vpop.eup %1509 }
 0x394   : > { %v804_v27 = vmul.f32 %v1508_v18, %v803_v25  ;;  %v810_v28 = vmul.f32 %v1510_v26, %v798_v19  ;;  %vm816_vm10 = vweird.f32 %v1510_v26 }
 0x395   : > { %vm817_vm12 = vmor %vm815_vm11, %vm816_vm10 }
 0x396   : > { %v808_v31 = vsel %vm807_vm9, %v1508_v18, %v804_v27  ;;  %v811_v32 = vmul.f32 %v1510_v26, %v810_v28 }
 0x397   : > { %v822_v33 = vmul.f32 %v1499_v30, %v808_v31 }
 0x398   : > { %v812_v29 = vmul.f32 0.5, %v811_v32 }
 0x399   : > { %v824_v36 = vmul.f32 %v822_v33, %v2049_v20  ;;  %v850_v20 = vld [vmem:[%s2105_s10] sm:$0x3] }
 0x39a   : > { %v813_v34 = vsub.f32 1.5, %v812_v29  ;;  %v852_v46 = vperm.slane %v850_v20, 0  ;;  %v853_v50 = vperm.slane %v850_v20, 1 }
 0x39b   : > { %v829_v41 = vadd.f32 %v1500_v37, %v824_v36 }
 0x39c   : > { %v814_v35 = vmul.f32 %v1510_v26, %v813_v34 }
 0x39d   : > { %v831_v43 = vadd.f32 %v829_v41, %v2039_v8 }
 0x39e   : > { %v818_v38 = vsel %vm817_vm12, %v1510_v26, %v814_v35 }
 0x39f   : > { %v823_v39 = vmul.f32 %v1499_v30, %v818_v38 }
 0x3a1   : > { %v825_v40 = vmul.f32 %v823_v39, %v2054_v24 }
 0x3a3   : > { %v830_v42 = vadd.f32 %v1500_v37, %v825_v40 }
 0x3a5   : > { %v832_v44 = vadd.f32 %v830_v42, %v2041_v9 }
 0x3a7   : > { %v833_v45 = vpack.c.bf16 %v832_v44, %v831_v43 }
 0x3a9   : > { %944 = vmatmul.bf16.vlgmr.msra.gmra.mxu1 %v833_v45  ;;  %958 = vmatmul.bf16.vlgmr.msra.gmra.mxu2 %v833_v45 }
 0x426   : > { %v945_v47 = vpop.f32.mrf.mxu1 }
 0x427   : > { %v946_v48 = vadd.f32 %v945_v47, %v852_v46 }
 0x429   : > { %v1336_v49 = vmul.f32 -1.442695, %v946_v48 }
 0x42b   : > { %1511 = vpow2.f32 %v1336_v49 }
 0x42c   : > { %v959_v24 = vpop.f32.mrf.mxu2 }
 0x42d   : > { %v960_v51 = vadd.f32 %v959_v24, %v853_v50 }
 0x42e   : > { %v947_v52 = vpop.f32.mrf.mxu1 }
 0x42f   : > { %v1337_v53 = vmul.f32 -1.442695, %v960_v51  ;;  %v948_v8 = vadd.f32 %v947_v52, %v852_v46 }
 0x431   : > { %v1512_v54 = vpop.eup %1511  ;;  %1513 = vpow2.f32 %v1337_v53  ;;  %v1338_v9 = vmul.f32 -1.442695, %v948_v8 }
 0x432   : > { %v976_v55 = vadd.f32 1.0, %v1512_v54 }
 0x433   : > { %1515 = vpow2.f32 %v1338_v9 }
 0x434   : > { %1517 = vrcp.f32 %v976_v55  ;;  %v961_v56 = vpop.f32.mrf.mxu2  ;;  %v991_v2 = vand.u32 2147483648, %v976_v55  ;;  %v989_v5 = vand.u32 2147483647, %v976_v55  ;;  %vm985_vm14 = vweird.f32 %v976_v55 }
 0x435   : > { %v962_v57 = vadd.f32 %v961_v56, %v853_v50 }
 0x436   : > { %v992_v12 = vor.u32 1.1754944e-38, %v991_v2  ;;  %vm990_vm0 = vcmp.eq.f32.partialorder %v989_v5, 8.507059e+37 }
 0x437   : > { %v1514_v58 = vpop.eup %1513  ;;  %v1339_v59 = vmul.f32 -1.442695, %v962_v57 }
 0x438   : > { %v977_v60 = vadd.f32 1.0, %v1514_v58 }
 0x439   : > { %v1516_v61 = vpop.eup %1515  ;;  %1519 = vpow2.f32 %v1339_v59 }
 0x43a   : > { %v1518_v62 = vpop.eup %1517  ;;  %1521 = vrcp.f32 %v977_v60  ;;  %v978_v0 = vadd.f32 1.0, %v1516_v61  ;;  %v1006_v17 = vand.u32 2147483648, %v977_v60  ;;  %v1004_v21 = vand.u32 2147483647, %v977_v60 }
 0x43b   : > { %v981_v63 = vmul.f32 %v1518_v62, %v976_v55  ;;  %vm986_vm13 = vweird.f32 %v1518_v62  ;;  %vm1000_vm2 = vweird.f32 %v977_v60 }
 0x43c   : > { %1523 = vrcp.f32 %v978_v0  ;;  %vm987_vm15 = vmor %vm985_vm14, %vm986_vm13  ;;  %v1021_v25 = vand.u32 2147483648, %v978_v0  ;;  %v1007_v27 = vor.u32 1.1754944e-38, %v1006_v17  ;;  %v1019_v30 = vand.u32 2147483647, %v978_v0 }
 0x43d   : > { %v982_v1 = vsub.f32 1.0, %v981_v63  ;;  %vm1005_vm5 = vcmp.eq.f32.partialorder %v1004_v21, 8.507059e+37  ;;  %vm1015_vm6 = vweird.f32 %v978_v0 }
 0x43e   : > { %v1022_v34 = vor.u32 1.1754944e-38, %v1021_v25  ;;  %vm1020_vm8 = vcmp.eq.f32.partialorder %v1019_v30, 8.507059e+37 }
 0x43f   : > { %v1520_v3 = vpop.eup %1519  ;;  %v983_v4 = vmul.f32 %v1518_v62, %v982_v1 }
 0x440   : > { %v1522_v6 = vpop.eup %1521  ;;  %v979_v7 = vadd.f32 1.0, %v1520_v3 }
 0x441   : > { %v984_v10 = vadd.f32 %v1518_v62, %v983_v4  ;;  %v996_v11 = vmul.f32 %v1522_v6, %v977_v60  ;;  %vm1001_vm1 = vweird.f32 %v1522_v6 }
 0x442   : > { %1525 = vrcp.f32 %v979_v7  ;;  %v1524_v13 = vpop.eup %1523  ;;  %vm1002_vm3 = vmor %vm1000_vm2, %vm1001_vm1  ;;  %v1036_v37 = vand.u32 2147483648, %v979_v7  ;;  %v1034_v40 = vand.u32 2147483647, %v979_v7  ;;  %vm1030_vm10 = vweird.f32 %v979_v7 }
 0x443   : > { %v988_v14 = vsel %vm987_vm15, %v1518_v62, %v984_v10  ;;  %v997_v15 = vsub.f32 1.0, %v996_v11  ;;  %v1011_v18 = vmul.f32 %v1524_v13, %v978_v0  ;;  %vm1016_vm4 = vweird.f32 %v1524_v13 }
 0x444   : > { %v993_v16 = vsel %vm990_vm0, %v992_v12, %v988_v14  ;;  %vm1017_vm7 = vmor %vm1015_vm6, %vm1016_vm4  ;;  %v1037_v42 = vor.u32 1.1754944e-38, %v1036_v37  ;;  %vm1035_vm12 = vcmp.eq.f32.partialorder %v1034_v40, 8.507059e+37 }
 0x445   : > { %1040 = vst [vmem:[#allocation14] sm:$0xff] %v993_v16  ;;  %v998_v19 = vmul.f32 %v1522_v6, %v997_v15  ;;  %v1012_v22 = vsub.f32 1.0, %v1011_v18 }
 0x447   : > { %v999_v23 = vadd.f32 %v1522_v6, %v998_v19  ;;  %v1013_v28 = vmul.f32 %v1524_v13, %v1012_v22 }
 0x448   : > { %v1526_v26 = vpop.eup %1525 }
 0x449   : > { %v1003_v31 = vsel %vm1002_vm3, %v1522_v6, %v999_v23  ;;  %v1026_v32 = vmul.f32 %v1526_v26, %v979_v7  ;;  %v1014_v33 = vadd.f32 %v1524_v13, %v1013_v28  ;;  %vm1031_vm9 = vweird.f32 %v1526_v26 }
 0x44a   : > { %v1008_v29 = vsel %vm1005_vm5, %v1007_v27, %v1003_v31  ;;  %vm1032_vm11 = vmor %vm1030_vm10, %vm1031_vm9 }
 0x44b   : > { %1041 = vst [vmem:[#allocation14 + $0x8] sm:$0xff] %v1008_v29  ;;  %v1027_v35 = vsub.f32 1.0, %v1026_v32  ;;  %v1018_v36 = vsel %vm1017_vm7, %v1524_v13, %v1014_v33 }
 0x44c   : > { %v1023_v38 = vsel %vm1020_vm8, %v1022_v34, %v1018_v36 }
 0x44d   : > { %v1028_v39 = vmul.f32 %v1526_v26, %v1027_v35  ;;  %1042 = vst [vmem:[#allocation14 + $0x10] sm:$0xff] %v1023_v38 }
 0x44f   : > { %v1029_v41 = vadd.f32 %v1526_v26, %v1028_v39 }
 0x451   : > { %v1033_v43 = vsel %vm1032_vm11, %v1526_v26, %v1029_v41 }
 0x452   : > { %v1038_v44 = vsel %vm1035_vm12, %v1037_v42, %v1033_v43 }
 0x453   : > { %1043 = vst [vmem:[#allocation14 + $0x18] sm:$0xff] %v1038_v44 }
 0x454 PF: > { %p1431_p3 = scmp.eq.s32.totalorder %s1910_s23, 2  ;;  %s2134_s3 = sld [smem:[#allocation29_spill]] }
 0x455   : > { %s1818_s27 = smov [#allocation14]   ;;  %s1819_s12 = smov 256  }
 0x456   : > { %s1053_s4 = sshll.u32 %s1818_s27, 4  ;;  %s1820_s0 = smov 16   ;;  %s1054_s4 = int_to_ptr.vmem [resolvable:$true] %s1053_s4 }
 0x45a   : > { %s1055_s5 = sshll.u32 %s2134_s3, 4  ;;  %s1056_s5 = int_to_ptr.hbm [resolvable:$true] %s1055_s5 }
 0x45b   : > { %1399 = dma.vmem_to_hbm [thread:$0]  (%p1431_p3), %s1054_s4, 512, %s1056_s5, [#allocation5], %s1819_s12, %s1819_s12, %s1820_s0  }
 0x45c   : > { %1780 = dma.done.wait (%p1431_p3), [#allocation5], 512  }
 0x45d   : > { %1782 = vsyncadd (%p1431_p3), [#allocation5], 4294966784 }
 0x45e PF: > { %s30_s22 = sadd.s32 1, %s1805_s22   ;;  %s2135_s9 = sld [smem:[#allocation21_spill]] }
 0x45f   : > { %p27_p4 = scmp.ge.s32.totalorder %s30_s22, 5   ;;  %s2136_s19 = sld [smem:[#allocation23_spill]] }
 0x460   : > { %s2137_s23 = sld [smem:[#allocation22_spill]]  ;;  %s2138_s17 = smov %s1789_s18 }
 0x461   : > { %s2140_s20 = smov %s1801_s21 }
 0x462   :  { %29 = sbr.rel (!%p27_p4) target bundleno = 16 (0x10), region = 139 }
 0x464   : > { %s2139_s18 = smov %s2135_s9 }
 0x466   : > { %s2141_s21 = smov %s2137_s23 }
 0x467   :  { %1072 = vsyncpa [#allocation4], 1 }
 0x468   :  { %1074 = vsyncpa [#allocation4 + $0x1], 1 }
 0x469   :  { %1075 = vsyncpa [#allocation7], 1 }
 0x46a   :  { %1077 = vsyncpa [#allocation7 + $0x1], 1 }
 0x46b   :  { %1078 = vsyncpa [#allocation10], 1 }
 0x46c   :  { %1079 = vsyncpa [#allocation13], 1 }
 0x46d   :  { %1080 = vsyncpa [#allocation5], 1 }
 0x46e   :  { %1082 = vsyncpa [#allocation5 + $0x1], 1 }

</bundles_post_ra>
